<compile_context>
chip_gen: v5e
topology: v5e:2x2
jax: 0.10.0
libtpu: 0.0.40
codegen_flags: <defaults>
</compile_context>

<pallas_src>
import jax
import jax.numpy as jnp
from jax.experimental import pallas as pl
from jax.experimental.pallas import tpu as pltpu

LANE = 128  # TPU lane width; pad the OUTPUT feature dim to a multiple of this.


def _round_up(n, m):
    return (n + m - 1) // m * m


def mlp_kernel(x_ref, w1_ref, b1_ref, wm_ref, bm_ref, wo_ref, bo_ref, out_ref):
    # fc1 + ReLU: cast x to bf16 in-kernel (free VPU work), MXU bf16 inputs,
    # f32 accumulation; bias add + ReLU in f32 (v5e VPU has no bf16).
    x = x_ref[...].astype(jnp.bfloat16)
    h = jnp.dot(x, w1_ref[...], preferred_element_type=jnp.float32)
    h = jnp.maximum(h + b1_ref[...], 0.0)
    # middle_linear1 + ReLU, applied TWICE with SHARED weights (as in the reference forward).
    h = jnp.dot(h.astype(jnp.bfloat16), wm_ref[...], preferred_element_type=jnp.float32)
    h = jnp.maximum(h + bm_ref[...], 0.0)
    h = jnp.dot(h.astype(jnp.bfloat16), wm_ref[...], preferred_element_type=jnp.float32)
    h = jnp.maximum(h + bm_ref[...], 0.0)
    # output_linear (no activation); D_out padded to a lane-dense 128 columns,
    # stored as bf16 to halve the output writeback bytes.
    out = jnp.dot(h.astype(jnp.bfloat16), wo_ref[...], preferred_element_type=jnp.float32)
    out_ref[...] = (out + bo_ref[...]).astype(out_ref.dtype)


def prepare_params(params):
    """One-time prep (hoisted out of the forward path):
    transpose PyTorch (out, in) weights to (in, out), cast matmul operands to
    bf16, zero-pad only D_out up to a multiple of 128 (D_in stays unpadded)."""
    d_in = params["w1"].shape[1]
    h = params["w1"].shape[0]
    d_out = params["w_out"].shape[0]
    d_out_p = _round_up(d_out, LANE)

    w1t = params["w1"].T.astype(jnp.bfloat16)                       # (d_in, h)
    wmt = params["w_m1"].T.astype(jnp.bfloat16)                     # (h, h)
    wot = jnp.zeros((h, d_out_p), jnp.bfloat16).at[:, :d_out].set(
        params["w_out"].T.astype(jnp.bfloat16))                     # (h, d_out_p)
    b1 = params["b1"].reshape(1, h).astype(jnp.float32)
    bm = params["b_m1"].reshape(1, h).astype(jnp.float32)
    bo = jnp.zeros((1, d_out_p), jnp.float32).at[:, :d_out].set(
        params["b_out"].reshape(1, d_out).astype(jnp.float32))
    return dict(w1t=w1t, b1=b1, wmt=wmt, bm=bm, wot=wot, bo=bo, d_out=d_out)


def make_forward(d_out, *, tile_n=512):
    """Build a jitted forward fn. tile_n: batch rows per grid step (multiple of 8).
    For large N, prefer a tile_n that gives >=4-6 grid steps so both v7x
    TensorCores stay fed and each core keeps intra-core double-buffering."""

    @jax.jit
    def forward(x, w1t, b1, wmt, bm, wot, bo):
        n, d_in = x.shape
        _, h = w1t.shape
        d_out_p = wot.shape[1]
        n_pad = _round_up(n, tile_n)

        # x stays f32 (cast to bf16 inside the kernel). Pad ONLY the batch dim,
        # and only when tile_n does not divide N (no-op for the common case).
        xp = x if n_pad == n else jnp.pad(x, ((0, n_pad - n), (0, 0)))
        grid = (n_pad // tile_n,)

        flops = 2 * n_pad * (d_in * h + 2 * h * h + h * d_out_p)
        bytes_accessed = (xp.size * 4                                   # x f32 in
                          + (w1t.size + wmt.size + wot.size) * 2        # weights bf16
                          + (b1.size + bm.size + bo.size) * 4           # biases f32
                          + n_pad * d_out_p * 2)                        # out bf16

        out_padded = pl.pallas_call(
            mlp_kernel,
            out_shape=jax.ShapeDtypeStruct((n_pad, d_out_p), jnp.bfloat16),
            grid=grid,
            in_specs=[
                # x: tiled over the batch axis (double-buffered by the pipeline);
                # last dim equals the full (unpadded) D_in, which is legal.
                pl.BlockSpec((tile_n, d_in), lambda i: (i, 0)),
                # weights / biases: constant index_map -> VMEM-resident, fetched once.
                pl.BlockSpec((d_in, h), lambda i: (0, 0)),
                pl.BlockSpec((1, h), lambda i: (0, 0)),
                pl.BlockSpec((h, h), lambda i: (0, 0)),
                pl.BlockSpec((1, h), lambda i: (0, 0)),
                pl.BlockSpec((h, d_out_p), lambda i: (0, 0)),
                pl.BlockSpec((1, d_out_p), lambda i: (0, 0)),
            ],
            out_specs=pl.BlockSpec((tile_n, d_out_p), lambda i: (i, 0)),
            compiler_params=pltpu.CompilerParams(
                dimension_semantics=("parallel",),  # shard batch across TCs (v7x)
            ),
            cost_estimate=pl.CostEstimate(
                flops=flops, transcendentals=0, bytes_accessed=bytes_accessed),
        )(xp, w1t, b1, wmt, bm, wot, bo)

        # Slice back to logical shape; tiny, so the f32 upcast is negligible.
        return out_padded[:n, :d_out].astype(jnp.float32)

    return forward


def init_params(key, D_in, H, D_out):
    """Deterministic init mirroring initializer(): normal_(mean=0, std=1) for
    Linear weights and biases."""
    ks = jax.random.split(key, 8)
    return {
        "w1": jax.random.normal(ks[0], (H, D_in), jnp.float32),
        "b1": jax.random.normal(ks[1], (H,), jnp.float32),
        "w_m1": jax.random.normal(ks[2], (H, H), jnp.float32),
        "b_m1": jax.random.normal(ks[3], (H,), jnp.float32),
        # middle_linear2 exists in __init__ but is unused in forward; created
        # here only for parameter-shape fidelity.
        "w_m2": jax.random.normal(ks[4], (H, H), jnp.float32),
        "b_m2": jax.random.normal(ks[5], (H,), jnp.float32),
        "w_out": jax.random.normal(ks[6], (D_out, H), jnp.float32),
        "b_out": jax.random.normal(ks[7], (D_out,), jnp.float32),
    }


if __name__ == "__main__":
    # Small shapes consistent with the module: N=512 with tile_n=512 exercises
    # the single-step (unpadded) path; D_in=64 / H=128 / D_out=16.
    N, D_in, H, D_out = 512, 64, 128, 16

    root = jax.random.PRNGKey(0)
    k_x, k_p = jax.random.split(root)
    x = jax.random.normal(k_x, (N, D_in), jnp.float32)
    params = init_params(k_p, D_in, H, D_out)

    prepped = prepare_params(params)
    forward = make_forward(d_out=prepped["d_out"], tile_n=512)

    out = forward(x, prepped["w1t"], prepped["b1"], prepped["wmt"],
                  prepped["bm"], prepped["wot"], prepped["bo"])
    out = jax.block_until_ready(out)

    # Pure-JAX reference with the SAME mixed precision (bf16 matmul inputs,
    # f32 accumulation, f32 bias/ReLU) to validate the kernel. The kernel
    # additionally stores bf16, so tolerances absorb the final ~0.4% rounding.
    def ref(x, p):
        w1 = p["w1"].T.astype(jnp.bfloat16)
        wm = p["w_m1"].T.astype(jnp.bfloat16)
        wo = p["w_out"].T.astype(jnp.bfloat16)
        h = jnp.maximum(jnp.dot(x.astype(jnp.bfloat16), w1,
                                preferred_element_type=jnp.float32) + p["b1"], 0.0)
        h = jnp.maximum(jnp.dot(h.astype(jnp.bfloat16), wm,
                                preferred_element_type=jnp.float32) + p["b_m1"], 0.0)
        h = jnp.maximum(jnp.dot(h.astype(jnp.bfloat16), wm,
                                preferred_element_type=jnp.float32) + p["b_m1"], 0.0)
        return jnp.dot(h.astype(jnp.bfloat16), wo,
                       preferred_element_type=jnp.float32) + p["b_out"]

    expected = ref(x, params)
    assert out.shape == (N, D_out)
    assert bool(jnp.all(jnp.isfinite(out)))
    assert jnp.allclose(out, expected, rtol=2e-2, atol=1e-2), (
        float(jnp.max(jnp.abs(out - expected))))
    print("KERNEL_OK")
</pallas_src>

<mosaic_0001>
module attributes {stable_mosaic.version = 11 : i64} {
  func.func @mlp_kernel(%arg0: i32, %arg1: memref<512x64xf32, #tpu.memory_space<vmem>>, %arg2: memref<64x128xbf16, #tpu.memory_space<vmem>>, %arg3: memref<1x128xf32, #tpu.memory_space<vmem>>, %arg4: memref<128x128xbf16, #tpu.memory_space<vmem>>, %arg5: memref<1x128xf32, #tpu.memory_space<vmem>>, %arg6: memref<128x128xbf16, #tpu.memory_space<vmem>>, %arg7: memref<1x128xf32, #tpu.memory_space<vmem>>, %arg8: memref<512x128xbf16, #tpu.memory_space<vmem>>) attributes {dimension_semantics = [#tpu.dimension_semantics<parallel>], iteration_bounds = array<i64: 1>, scalar_prefetch = 0 : i64, scratch_operands = 0 : i64, tpu.core_type = #tpu.core_type<tc>, window_params = [{transform_indices = @transform_0, window_bounds = array<i64: 512, 64>}, {pipeline_mode = #tpu.pipeline_mode<synchronous>, transform_indices = @transform_1, window_bounds = array<i64: 64, 128>}, {pipeline_mode = #tpu.pipeline_mode<synchronous>, transform_indices = @transform_2, window_bounds = array<i64: 1, 128>}, {pipeline_mode = #tpu.pipeline_mode<synchronous>, transform_indices = @transform_3, window_bounds = array<i64: 128, 128>}, {pipeline_mode = #tpu.pipeline_mode<synchronous>, transform_indices = @transform_4, window_bounds = array<i64: 1, 128>}, {pipeline_mode = #tpu.pipeline_mode<synchronous>, transform_indices = @transform_5, window_bounds = array<i64: 128, 128>}, {pipeline_mode = #tpu.pipeline_mode<synchronous>, transform_indices = @transform_6, window_bounds = array<i64: 1, 128>}, {transform_indices = @transform_7, window_bounds = array<i64: 512, 128>}]} {
    %c0 = arith.constant 0 : index
    %c0_0 = arith.constant 0 : index
    %0 = vector.load %arg1[%c0, %c0_0] : memref<512x64xf32, #tpu.memory_space<vmem>>, vector<512x64xf32>
    %1 = arith.truncf %0 : vector<512x64xf32> to vector<512x64xbf16>
    %c0_1 = arith.constant 0 : index
    %c0_2 = arith.constant 0 : index
    %2 = vector.load %arg2[%c0_1, %c0_2] : memref<64x128xbf16, #tpu.memory_space<vmem>>, vector<64x128xbf16>
    %cst = arith.constant dense<0.000000e+00> : vector<512x128xf32>
    %3 = tpu.matmul %1, %2, %cst {dimension_numbers = #tpu.dot_dimension_numbers<[1], [0], [0], [1], [0, 0, 1, 1], [], []>} : vector<512x64xbf16>, vector<64x128xbf16>, vector<512x128xf32> -> vector<512x128xf32>
    %c0_3 = arith.constant 0 : index
    %c0_4 = arith.constant 0 : index
    %4 = vector.load %arg3[%c0_3, %c0_4] : memref<1x128xf32, #tpu.memory_space<vmem>>, vector<1x128xf32>
    %5 = vector.broadcast %4 : vector<1x128xf32> to vector<512x128xf32>
    %6 = arith.addf %3, %5 : vector<512x128xf32>
    %cst_5 = arith.constant 0.000000e+00 : f32
    %7 = vector.broadcast %cst_5 : f32 to vector<512x128xf32>
    %8 = arith.maximumf %6, %7 : vector<512x128xf32>
    %9 = arith.truncf %8 : vector<512x128xf32> to vector<512x128xbf16>
    %c0_6 = arith.constant 0 : index
    %c0_7 = arith.constant 0 : index
    %10 = vector.load %arg4[%c0_6, %c0_7] : memref<128x128xbf16, #tpu.memory_space<vmem>>, vector<128x128xbf16>
    %cst_8 = arith.constant dense<0.000000e+00> : vector<512x128xf32>
    %11 = tpu.matmul %9, %10, %cst_8 {dimension_numbers = #tpu.dot_dimension_numbers<[1], [0], [0], [1], [0, 0, 1, 1], [], []>} : vector<512x128xbf16>, vector<128x128xbf16>, vector<512x128xf32> -> vector<512x128xf32>
    %c0_9 = arith.constant 0 : index
    %c0_10 = arith.constant 0 : index
    %12 = vector.load %arg5[%c0_9, %c0_10] : memref<1x128xf32, #tpu.memory_space<vmem>>, vector<1x128xf32>
    %13 = vector.broadcast %12 : vector<1x128xf32> to vector<512x128xf32>
    %14 = arith.addf %11, %13 : vector<512x128xf32>
    %cst_11 = arith.constant 0.000000e+00 : f32
    %15 = vector.broadcast %cst_11 : f32 to vector<512x128xf32>
    %16 = arith.maximumf %14, %15 : vector<512x128xf32>
    %17 = arith.truncf %16 : vector<512x128xf32> to vector<512x128xbf16>
    %c0_12 = arith.constant 0 : index
    %c0_13 = arith.constant 0 : index
    %18 = vector.load %arg4[%c0_12, %c0_13] : memref<128x128xbf16, #tpu.memory_space<vmem>>, vector<128x128xbf16>
    %cst_14 = arith.constant dense<0.000000e+00> : vector<512x128xf32>
    %19 = tpu.matmul %17, %18, %cst_14 {dimension_numbers = #tpu.dot_dimension_numbers<[1], [0], [0], [1], [0, 0, 1, 1], [], []>} : vector<512x128xbf16>, vector<128x128xbf16>, vector<512x128xf32> -> vector<512x128xf32>
    %c0_15 = arith.constant 0 : index
    %c0_16 = arith.constant 0 : index
    %20 = vector.load %arg5[%c0_15, %c0_16] : memref<1x128xf32, #tpu.memory_space<vmem>>, vector<1x128xf32>
    %21 = vector.broadcast %20 : vector<1x128xf32> to vector<512x128xf32>
    %22 = arith.addf %19, %21 : vector<512x128xf32>
    %cst_17 = arith.constant 0.000000e+00 : f32
    %23 = vector.broadcast %cst_17 : f32 to vector<512x128xf32>
    %24 = arith.maximumf %22, %23 : vector<512x128xf32>
    %25 = arith.truncf %24 : vector<512x128xf32> to vector<512x128xbf16>
    %c0_18 = arith.constant 0 : index
    %c0_19 = arith.constant 0 : index
    %26 = vector.load %arg6[%c0_18, %c0_19] : memref<128x128xbf16, #tpu.memory_space<vmem>>, vector<128x128xbf16>
    %cst_20 = arith.constant dense<0.000000e+00> : vector<512x128xf32>
    %27 = tpu.matmul %25, %26, %cst_20 {dimension_numbers = #tpu.dot_dimension_numbers<[1], [0], [0], [1], [0, 0, 1, 1], [], []>} : vector<512x128xbf16>, vector<128x128xbf16>, vector<512x128xf32> -> vector<512x128xf32>
    %c0_21 = arith.constant 0 : index
    %c0_22 = arith.constant 0 : index
    %28 = vector.load %arg7[%c0_21, %c0_22] : memref<1x128xf32, #tpu.memory_space<vmem>>, vector<1x128xf32>
    %29 = vector.broadcast %28 : vector<1x128xf32> to vector<512x128xf32>
    %30 = arith.addf %27, %29 : vector<512x128xf32>
    %31 = arith.truncf %30 : vector<512x128xf32> to vector<512x128xbf16>
    %c0_23 = arith.constant 0 : index
    %c0_24 = arith.constant 0 : index
    %32 = vector.load %arg8[%c0_23, %c0_24] : memref<512x128xbf16, #tpu.memory_space<vmem>>, vector<512x128xbf16>
    tpu.vector_store %arg8[%c0_23, %c0_24], %31 {strides = array<i32>} : memref<512x128xbf16, #tpu.memory_space<vmem>>, vector<512x128xbf16>,
    return
  }
  func.func @transform_0(%arg0: i32) -> (i32, i32) {
    %c0_i32 = arith.constant 0 : i32
    %c0_i32_0 = arith.constant 0 : i32
    return %arg0, %c0_i32 : i32, i32
  }
  func.func @transform_1(%arg0: i32) -> (i32, i32) {
    %c0_i32 = arith.constant 0 : i32
    %c0_i32_0 = arith.constant 0 : i32
    %c0_i32_1 = arith.constant 0 : i32
    return %c0_i32, %c0_i32_0 : i32, i32
  }
  func.func @transform_2(%arg0: i32) -> (i32, i32) {
    %c0_i32 = arith.constant 0 : i32
    %c0_i32_0 = arith.constant 0 : i32
    %c0_i32_1 = arith.constant 0 : i32
    return %c0_i32, %c0_i32_0 : i32, i32
  }
  func.func @transform_3(%arg0: i32) -> (i32, i32) {
    %c0_i32 = arith.constant 0 : i32
    %c0_i32_0 = arith.constant 0 : i32
    %c0_i32_1 = arith.constant 0 : i32
    return %c0_i32, %c0_i32_0 : i32, i32
  }
  func.func @transform_4(%arg0: i32) -> (i32, i32) {
    %c0_i32 = arith.constant 0 : i32
    %c0_i32_0 = arith.constant 0 : i32
    %c0_i32_1 = arith.constant 0 : i32
    return %c0_i32, %c0_i32_0 : i32, i32
  }
  func.func @transform_5(%arg0: i32) -> (i32, i32) {
    %c0_i32 = arith.constant 0 : i32
    %c0_i32_0 = arith.constant 0 : i32
    %c0_i32_1 = arith.constant 0 : i32
    return %c0_i32, %c0_i32_0 : i32, i32
  }
  func.func @transform_6(%arg0: i32) -> (i32, i32) {
    %c0_i32 = arith.constant 0 : i32
    %c0_i32_0 = arith.constant 0 : i32
    %c0_i32_1 = arith.constant 0 : i32
    return %c0_i32, %c0_i32_0 : i32, i32
  }
  func.func @transform_7(%arg0: i32) -> (i32, i32) {
    %c0_i32 = arith.constant 0 : i32
    %c0_i32_0 = arith.constant 0 : i32
    return %arg0, %c0_i32 : i32, i32
  }
}

</mosaic_0001>

<bundles_post_ra>
// kernel: forward.1
= control target key start
LH: loop header
LB: loop body
LE: loop exit
PB: predicated region body
PF: predicated region fallthrough
CT: control target
= control target key end

     0   :  { %vm159_vm0 = vcmask 523264   ;;  %s2517_s1 = inlined_call_operand.vmem [shape: bf16[64,128], index: 1, kind: input, shape index: {}]   ;;  %s2518_s2 = inlined_call_operand.vmem [shape: f32[1,128], index: 2, kind: input, shape index: {}]   ;;  %s2519_s0 = inlined_call_operand.vmem [shape: f32[512,64], index: 0, kind: input, shape index: {}]   ;;  %s2520_s3 = inlined_call_operand.vmem [shape: bf16[128,128], index: 3, kind: input, shape index: {}]   ;;  %s2521_s4 = inlined_call_operand.vmem [shape: f32[1,128], index: 4, kind: input, shape index: {}]   ;;  %s2522_s5 = inlined_call_operand.vmem [shape: bf16[128,128], index: 5, kind: input, shape index: {}]   ;;  %s2523_s6 = inlined_call_operand.vmem [shape: f32[1,128], index: 6, kind: input, shape index: {}]   ;;  %s2524_s7 = inlined_call_operand.vmem [shape: bf16[512,128], index: 7, kind: output, shape index: {}]  }
   0x1   :  { %v1603_v0 = vld [vmem:[%s2517_s1 + $0x18] sm:$0xff]  ;;  %v1602_v1 = vld [vmem:[%s2517_s1 + $0x10] sm:$0xff]  ;;  %v1601_v2 = vld [vmem:[%s2517_s1 + $0x8] sm:$0xff] }
   0x2   :  { %260 = vmatpush.bf16.msra.mxu0 %v1603_v0  ;;  %v1600_v3 = vld [vmem:[%s2517_s1] sm:$0xff]  ;;  %v28_v5 = vld [vmem:[%s2519_s0 + $0x8] sm:$0xff]  ;;  %v29_v7 = vld [vmem:[%s2519_s0 + $0x10] sm:$0xff] }
   0x3   :  { %v27_v4 = vld [vmem:[%s2519_s0] sm:$0xff]  ;;  %v30_v8 = vld [vmem:[%s2519_s0 + $0x18] sm:$0xff]  ;;  %v32_v11 = vld [vmem:[%s2519_s0 + $0x28] sm:$0xff] }
   0x4   :  { %v91_v6 = vpack.c.bf16 %v28_v5, %v27_v4  ;;  %v92_v9 = vpack.c.bf16 %v30_v8, %v29_v7  ;;  %v31_v10 = vld [vmem:[%s2519_s0 + $0x20] sm:$0xff]  ;;  %v33_v13 = vld [vmem:[%s2519_s0 + $0x30] sm:$0xff]  ;;  %v34_v14 = vld [vmem:[%s2519_s0 + $0x38] sm:$0xff] }
   0x5   :  { %v93_v12 = vpack.c.bf16 %v32_v11, %v31_v10  ;;  %v94_v15 = vpack.c.bf16 %v34_v14, %v33_v13  ;;  %v35_v16 = vld [vmem:[%s2519_s0 + $0x40] sm:$0xff]  ;;  %v36_v17 = vld [vmem:[%s2519_s0 + $0x48] sm:$0xff]  ;;  %v1611_v19 = vld [vmem:[%s2520_s3 + $0x38] sm:$0xff] }
   0x6   :  { %261 = vmatpush.bf16.msra.mxu0 %v1602_v1  ;;  %v95_v18 = vpack.c.bf16 %v36_v17, %v35_v16  ;;  %589 = vmatpush.bf16.msra.mxu1 %v1611_v19  ;;  %v37_v20 = vld [vmem:[%s2519_s0 + $0x50] sm:$0xff]  ;;  %v38_v21 = vld [vmem:[%s2519_s0 + $0x58] sm:$0xff]  ;;  %v1609_v24 = vld [vmem:[%s2520_s3 + $0x28] sm:$0xff] }
   0x7   :  { %854 = vmatpush.bf16.msra.mxu2 %v1611_v19  ;;  %v96_v22 = vpack.c.bf16 %v38_v21, %v37_v20  ;;  %v1610_v23 = vld [vmem:[%s2520_s3 + $0x30] sm:$0xff]  ;;  %v1608_v25 = vld [vmem:[%s2520_s3 + $0x20] sm:$0xff]  ;;  %v40_v27 = vld [vmem:[%s2519_s0 + $0x68] sm:$0xff] }
   0x8   :  { %v39_v26 = vld [vmem:[%s2519_s0 + $0x60] sm:$0xff]  ;;  %v1607_v28 = vld [vmem:[%s2520_s3 + $0x18] sm:$0xff]  ;;  %v1606_v30 = vld [vmem:[%s2520_s3 + $0x10] sm:$0xff] }
   0x9   :  { %v97_v29 = vpack.c.bf16 %v40_v27, %v39_v26  ;;  %v1605_v31 = vld [vmem:[%s2520_s3 + $0x8] sm:$0xff]  ;;  %v1604_v32 = vld [vmem:[%s2520_s3] sm:$0xff]  ;;  %v41_v33 = vld [vmem:[%s2519_s0 + $0x70] sm:$0xff] }
   0xa   :  { %262 = vmatpush.bf16.msra.mxu0 %v1601_v2  ;;  %590 = vmatpush.bf16.msra.mxu1 %v1610_v23  ;;  %v42_v34 = vld [vmem:[%s2519_s0 + $0x78] sm:$0xff]  ;;  %v43_v36 = vld [vmem:[%s2519_s0 + $0x80] sm:$0xff]  ;;  %v44_v37 = vld [vmem:[%s2519_s0 + $0x88] sm:$0xff] }
   0xb   :  { %855 = vmatpush.bf16.msra.mxu2 %v1610_v23  ;;  %v98_v35 = vpack.c.bf16 %v42_v34, %v41_v33  ;;  %v99_v38 = vpack.c.bf16 %v44_v37, %v43_v36  ;;  %v1958_v40 = vld [vmem:[%s2518_s2] ss:$0 sm:$0xff]  ;;  %v45_v46 = vld [vmem:[%s2519_s0 + $0x90] sm:$0xff]  ;;  %v46_v47 = vld [vmem:[%s2519_s0 + $0x98] sm:$0xff] }
   0xc   :  { %v100_v49 = vpack.c.bf16 %v46_v47, %v45_v46  ;;  %v47_v56 = vld [vmem:[%s2519_s0 + $0xa0] sm:$0xff]  ;;  %v48_v57 = vld [vmem:[%s2519_s0 + $0xa8] sm:$0xff]  ;;  %v49_v2 = vld [vmem:[%s2519_s0 + $0xb0] sm:$0xff] }
   0xd   :  { %v101_v59 = vpack.c.bf16 %v48_v57, %v47_v56  ;;  %v52_v13 = vld [vmem:[%s2519_s0 + $0xc8] sm:$0xff]  ;;  %v54_v23 = vld [vmem:[%s2519_s0 + $0xd8] sm:$0xff] }
   0xe   :  { %263 = vmatpush.bf16.msra.mxu0 %v1600_v3  ;;  %591 = vmatpush.bf16.msra.mxu1 %v1609_v24  ;;  %v50_v3 = vld [vmem:[%s2519_s0 + $0xb8] sm:$0xff]  ;;  %v56_v33 = vld [vmem:[%s2519_s0 + $0xe8] sm:$0xff] }
   0xf   :  { %856 = vmatpush.bf16.msra.mxu2 %v1609_v24  ;;  %v102_v5 = vpack.c.bf16 %v50_v3, %v49_v2  ;;  %v2044_v3 = vld [vmem:[%s2521_s4] ss:$0 sm:$0xff] }
  0x11   :  { %1504 = vmatmul.msk.bf16.vlgmr.msra.gmra.mxu0 %vm159_vm0, %v91_v6 }
  0x12   :  { %592 = vmatpush.bf16.msra.mxu1 %v1608_v25 }
  0x13   :  { %857 = vmatpush.bf16.msra.mxu2 %v1608_v25 }
  0x16   :  { %593 = vmatpush.bf16.msra.mxu1 %v1607_v28 }
  0x17   :  { %858 = vmatpush.bf16.msra.mxu2 %v1607_v28 }
  0x1a   :  { %594 = vmatpush.bf16.msra.mxu1 %v1606_v30 }
  0x1b   :  { %859 = vmatpush.bf16.msra.mxu2 %v1606_v30 }
  0x1e   :  { %595 = vmatpush.bf16.msra.mxu1 %v1605_v31 }
  0x1f   :  { %860 = vmatpush.bf16.msra.mxu2 %v1605_v31 }
  0x21   :  { %1505 = vmatmul.msk.bf16.gmra.mxu0 %vm159_vm0, %v92_v9 }
  0x22   :  { %596 = vmatpush.bf16.msra.mxu1 %v1604_v32 }
  0x23   :  { %861 = vmatpush.bf16.msra.mxu2 %v1604_v32  ;;  %v55_v32 = vld [vmem:[%s2519_s0 + $0xe0] sm:$0xff] }
  0x31   :  { %1506 = vmatmul.msk.bf16.gmra.mxu0 %vm159_vm0, %v93_v12  ;;  %v51_v12 = vld [vmem:[%s2519_s0 + $0xc0] sm:$0xff] }
  0x41   :  { %1507 = vmatmul.msk.bf16.gmra.mxu0 %vm159_vm0, %v94_v15  ;;  %v103_v15 = vpack.c.bf16 %v52_v13, %v51_v12 }
  0x51   :  { %1508 = vmatmul.msk.bf16.gmra.mxu0 %vm159_vm0, %v95_v18 }
  0x61   :  { %1509 = vmatmul.msk.bf16.gmra.mxu0 %vm159_vm0, %v96_v22  ;;  %v53_v22 = vld [vmem:[%s2519_s0 + $0xd0] sm:$0xff] }
  0x62   :  { %v104_v25 = vpack.c.bf16 %v54_v23, %v53_v22 }
  0x71   :  { %1510 = vmatmul.msk.bf16.gmra.mxu0 %vm159_vm0, %v97_v29 }
  0x81   :  { %1511 = vmatmul.msk.bf16.gmra.mxu0 %vm159_vm0, %v98_v35  ;;  %v105_v35 = vpack.c.bf16 %v56_v33, %v55_v32 }
  0x8e   :  { %v265_v39 = vpop.f32.mrf.mxu0 }
  0x8f   :  { %v266_v41 = vadd.f32 %v1958_v40, %v265_v39 }
  0x91   :  { %1512 = vmatmul.msk.bf16.gmra.mxu0 %vm159_vm0, %v99_v38  ;;  %v425_v44 = vmax.f32 %v266_v41, 0.0 }
  0x96   :  { %v267_v42 = vpop.f32.mrf.mxu0 }
  0x97   :  { %v268_v43 = vadd.f32 %v1958_v40, %v267_v42 }
  0x99   :  { %v426_v45 = vmax.f32 %v268_v43, 0.0  ;;  %v57_v43 = vld [vmem:[%s2519_s0 + $0xf0] sm:$0xff] }
  0x9b   :  { %v489_v48 = vpack.c.bf16 %v426_v45, %v425_v44  ;;  %v58_v44 = vld [vmem:[%s2519_s0 + $0xf8] sm:$0xff] }
  0x9c   :  { %v106_v46 = vpack.c.bf16 %v58_v44, %v57_v43 }
  0x9d   :  { %597 = vmatmul.bf16.vlgmr.msra.gmra.mxu1 %v489_v48 }
  0x9e   :  { %v270_v50 = vpop.f32.mrf.mxu0 }
  0x9f   :  { %v271_v51 = vadd.f32 %v1958_v40, %v270_v50 }
  0xa1   :  { %1513 = vmatmul.msk.bf16.gmra.mxu0 %vm159_vm0, %v100_v49  ;;  %v427_v54 = vmax.f32 %v271_v51, 0.0 }
  0xa6   :  { %v272_v52 = vpop.f32.mrf.mxu0 }
  0xa7   :  { %v273_v53 = vadd.f32 %v1958_v40, %v272_v52 }
  0xa9   :  { %v428_v55 = vmax.f32 %v273_v53, 0.0  ;;  %v59_v53 = vld [vmem:[%s2519_s0 + $0x100] sm:$0xff] }
  0xab   :  { %v490_v58 = vpack.c.bf16 %v428_v55, %v427_v54  ;;  %v60_v54 = vld [vmem:[%s2519_s0 + $0x108] sm:$0xff] }
  0xac   :  { %v107_v56 = vpack.c.bf16 %v60_v54, %v59_v53  ;;  %v67_v53 = vld [vmem:[%s2519_s0 + $0x140] sm:$0xff]  ;;  %v68_v54 = vld [vmem:[%s2519_s0 + $0x148] sm:$0xff] }
  0xad   :  { %602 = vmatmul.bf16.gmra.mxu1 %v490_v58 }
  0xae   :  { %v275_v60 = vpop.f32.mrf.mxu0 }
  0xaf   :  { %v276_v61 = vadd.f32 %v1958_v40, %v275_v60 }
  0xb1   :  { %1514 = vmatmul.msk.bf16.gmra.mxu0 %vm159_vm0, %v101_v59  ;;  %v429_v0 = vmax.f32 %v276_v61, 0.0 }
  0xb6   :  { %v277_v62 = vpop.f32.mrf.mxu0 }
  0xb7   :  { %v278_v63 = vadd.f32 %v1958_v40, %v277_v62 }
  0xb9   :  { %v430_v1 = vmax.f32 %v278_v63, 0.0 }
  0xbb   :  { %v491_v4 = vpack.c.bf16 %v430_v1, %v429_v0  ;;  %v61_v0 = vld [vmem:[%s2519_s0 + $0x110] sm:$0xff]  ;;  %v62_v1 = vld [vmem:[%s2519_s0 + $0x118] sm:$0xff] }
  0xbd   :  { %607 = vmatmul.bf16.gmra.mxu1 %v491_v4  ;;  %v108_v4 = vpack.c.bf16 %v62_v1, %v61_v0 }
  0xbe   :  { %v280_v6 = vpop.f32.mrf.mxu0 }
  0xbf   :  { %v281_v7 = vadd.f32 %v1958_v40, %v280_v6 }
  0xc1   :  { %1515 = vmatmul.msk.bf16.gmra.mxu0 %vm159_vm0, %v102_v5  ;;  %v431_v10 = vmax.f32 %v281_v7, 0.0 }
  0xc6   :  { %v282_v8 = vpop.f32.mrf.mxu0 }
  0xc7   :  { %v283_v9 = vadd.f32 %v1958_v40, %v282_v8 }
  0xc9   :  { %v432_v11 = vmax.f32 %v283_v9, 0.0 }
  0xcb   :  { %v492_v14 = vpack.c.bf16 %v432_v11, %v431_v10 }
  0xcd   :  { %612 = vmatmul.bf16.gmra.mxu1 %v492_v14 }
  0xce   :  { %v285_v16 = vpop.f32.mrf.mxu0 }
  0xcf   :  { %v286_v17 = vadd.f32 %v1958_v40, %v285_v16 }
  0xd1   :  { %1516 = vmatmul.msk.bf16.gmra.mxu0 %vm159_vm0, %v103_v15  ;;  %v433_v20 = vmax.f32 %v286_v17, 0.0 }
  0xd6   :  { %v287_v18 = vpop.f32.mrf.mxu0 }
  0xd7   :  { %v288_v19 = vadd.f32 %v1958_v40, %v287_v18  ;;  %v63_v18 = vld [vmem:[%s2519_s0 + $0x120] sm:$0xff] }
  0xd9   :  { %v434_v21 = vmax.f32 %v288_v19, 0.0  ;;  %v64_v19 = vld [vmem:[%s2519_s0 + $0x128] sm:$0xff] }
  0xdb   :  { %v493_v24 = vpack.c.bf16 %v434_v21, %v433_v20  ;;  %v109_v21 = vpack.c.bf16 %v64_v19, %v63_v18 }
  0xdd   :  { %617 = vmatmul.bf16.gmra.mxu1 %v493_v24 }
  0xde   :  { %v290_v26 = vpop.f32.mrf.mxu0 }
  0xdf   :  { %v291_v27 = vadd.f32 %v1958_v40, %v290_v26 }
  0xe1   :  { %1517 = vmatmul.msk.bf16.gmra.mxu0 %vm159_vm0, %v104_v25  ;;  %v435_v30 = vmax.f32 %v291_v27, 0.0 }
  0xe6   :  { %v292_v28 = vpop.f32.mrf.mxu0 }
  0xe7   :  { %v293_v29 = vadd.f32 %v1958_v40, %v292_v28 }
  0xe9   :  { %v436_v31 = vmax.f32 %v293_v29, 0.0 }
  0xeb   :  { %v494_v34 = vpack.c.bf16 %v436_v31, %v435_v30 }
  0xed   :  { %622 = vmatmul.bf16.gmra.mxu1 %v494_v34 }
  0xee   :  { %v295_v36 = vpop.f32.mrf.mxu0 }
  0xef   :  { %v296_v37 = vadd.f32 %v1958_v40, %v295_v36  ;;  %v66_v36 = vld [vmem:[%s2519_s0 + $0x138] sm:$0xff] }
  0xf1   :  { %1518 = vmatmul.msk.bf16.gmra.mxu0 %vm159_vm0, %v105_v35  ;;  %v437_v41 = vmax.f32 %v296_v37, 0.0  ;;  %v65_v35 = vld [vmem:[%s2519_s0 + $0x130] sm:$0xff] }
  0xf6   :  { %v297_v38 = vpop.f32.mrf.mxu0 }
  0xf7   :  { %v298_v39 = vadd.f32 %v1958_v40, %v297_v38  ;;  %v110_v38 = vpack.c.bf16 %v66_v36, %v65_v35 }
  0xf9   :  { %v438_v42 = vmax.f32 %v298_v39, 0.0 }
  0xfb   :  { %v495_v45 = vpack.c.bf16 %v438_v42, %v437_v41 }
  0xfd   :  { %627 = vmatmul.bf16.gmra.mxu1 %v495_v45 }
  0xfe   :  { %v300_v47 = vpop.f32.mrf.mxu0 }
  0xff   :  { %v301_v48 = vadd.f32 %v1958_v40, %v300_v47 }
 0x101   :  { %1519 = vmatmul.msk.bf16.gmra.mxu0 %vm159_vm0, %v106_v46  ;;  %v439_v51 = vmax.f32 %v301_v48, 0.0 }
 0x106   :  { %v302_v49 = vpop.f32.mrf.mxu0 }
 0x107   :  { %v303_v50 = vadd.f32 %v1958_v40, %v302_v49 }
 0x109   :  { %v440_v52 = vmax.f32 %v303_v50, 0.0 }
 0x10b   :  { %v496_v55 = vpack.c.bf16 %v440_v52, %v439_v51 }
 0x10d   :  { %632 = vmatmul.bf16.gmra.mxu1 %v496_v55 }
 0x10e   :  { %v305_v57 = vpop.f32.mrf.mxu0 }
 0x10f   :  { %v306_v58 = vadd.f32 %v1958_v40, %v305_v57 }
 0x111   :  { %1520 = vmatmul.msk.bf16.gmra.mxu0 %vm159_vm0, %v107_v56  ;;  %v441_v61 = vmax.f32 %v306_v58, 0.0  ;;  %v111_v56 = vpack.c.bf16 %v68_v54, %v67_v53 }
 0x116   :  { %v307_v59 = vpop.f32.mrf.mxu0 }
 0x117   :  { %v308_v60 = vadd.f32 %v1958_v40, %v307_v59 }
 0x119   :  { %v442_v62 = vmax.f32 %v308_v60, 0.0 }
 0x11a   :  { %v598_v63 = vpop.f32.mrf.mxu1 }
 0x11b   :  { %v497_v2 = vpack.c.bf16 %v442_v62, %v441_v61  ;;  %v599_v6 = vadd.f32 %v2044_v3, %v598_v63 }
 0x11d   :  { %637 = vmatmul.bf16.gmra.mxu1 %v497_v2  ;;  %v758_v9 = vmax.f32 %v599_v6, 0.0 }
 0x11e   :  { %v310_v5 = vpop.f32.mrf.mxu0 }
 0x11f   :  { %v311_v10 = vadd.f32 %v1958_v40, %v310_v5 }
 0x121   :  { %1521 = vmatmul.msk.bf16.gmra.mxu0 %vm159_vm0, %v108_v4  ;;  %v443_v15 = vmax.f32 %v311_v10, 0.0 }
 0x122   :  { %v600_v7 = vpop.f32.mrf.mxu1 }
 0x123   :  { %v601_v8 = vadd.f32 %v2044_v3, %v600_v7  ;;  %v69_v7 = vld [vmem:[%s2519_s0 + $0x150] sm:$0xff] }
 0x125   :  { %v759_v11 = vmax.f32 %v601_v8, 0.0  ;;  %v70_v8 = vld [vmem:[%s2519_s0 + $0x158] sm:$0xff] }
 0x126   :  { %v312_v12 = vpop.f32.mrf.mxu0  ;;  %v112_v10 = vpack.c.bf16 %v70_v8, %v69_v7 }
 0x127   :  { %v313_v13 = vadd.f32 %v1958_v40, %v312_v12  ;;  %v822_v14 = vpack.c.bf16 %v759_v11, %v758_v9 }
 0x129   :  { %v444_v16 = vmax.f32 %v313_v13, 0.0  ;;  %862 = vmatmul.bf16.vlgmr.msra.gmra.mxu2 %v822_v14 }
 0x12a   :  { %v603_v17 = vpop.f32.mrf.mxu1 }
 0x12b   :  { %v498_v20 = vpack.c.bf16 %v444_v16, %v443_v15  ;;  %v604_v23 = vadd.f32 %v2044_v3, %v603_v17 }
 0x12d   :  { %642 = vmatmul.bf16.gmra.mxu1 %v498_v20  ;;  %v760_v26 = vmax.f32 %v604_v23, 0.0 }
 0x12e   :  { %v315_v22 = vpop.f32.mrf.mxu0 }
 0x12f   :  { %v316_v27 = vadd.f32 %v1958_v40, %v315_v22 }
 0x131   :  { %1522 = vmatmul.msk.bf16.gmra.mxu0 %vm159_vm0, %v109_v21  ;;  %v445_v32 = vmax.f32 %v316_v27, 0.0 }
 0x132   :  { %v605_v24 = vpop.f32.mrf.mxu1 }
 0x133   :  { %v606_v25 = vadd.f32 %v2044_v3, %v605_v24  ;;  %v71_v24 = vld [vmem:[%s2519_s0 + $0x160] sm:$0xff] }
 0x135   :  { %v761_v28 = vmax.f32 %v606_v25, 0.0  ;;  %v72_v25 = vld [vmem:[%s2519_s0 + $0x168] sm:$0xff] }
 0x136   :  { %v317_v29 = vpop.f32.mrf.mxu0  ;;  %v113_v27 = vpack.c.bf16 %v72_v25, %v71_v24 }
 0x137   :  { %v318_v30 = vadd.f32 %v1958_v40, %v317_v29  ;;  %v823_v31 = vpack.c.bf16 %v761_v28, %v760_v26 }
 0x139   :  { %v446_v33 = vmax.f32 %v318_v30, 0.0  ;;  %867 = vmatmul.bf16.gmra.mxu2 %v823_v31 }
 0x13a   :  { %v608_v34 = vpop.f32.mrf.mxu1 }
 0x13b   :  { %v499_v37 = vpack.c.bf16 %v446_v33, %v445_v32  ;;  %v609_v41 = vadd.f32 %v2044_v3, %v608_v34 }
 0x13d   :  { %647 = vmatmul.bf16.gmra.mxu1 %v499_v37  ;;  %v762_v44 = vmax.f32 %v609_v41, 0.0 }
 0x13e   :  { %v320_v39 = vpop.f32.mrf.mxu0 }
 0x13f   :  { %v321_v45 = vadd.f32 %v1958_v40, %v320_v39 }
 0x141   :  { %1523 = vmatmul.msk.bf16.gmra.mxu0 %vm159_vm0, %v110_v38  ;;  %v447_v50 = vmax.f32 %v321_v45, 0.0 }
 0x142   :  { %v610_v42 = vpop.f32.mrf.mxu1 }
 0x143   :  { %v611_v43 = vadd.f32 %v2044_v3, %v610_v42  ;;  %v73_v42 = vld [vmem:[%s2519_s0 + $0x170] sm:$0xff] }
 0x145   :  { %v763_v46 = vmax.f32 %v611_v43, 0.0  ;;  %v74_v43 = vld [vmem:[%s2519_s0 + $0x178] sm:$0xff] }
 0x146   :  { %v322_v47 = vpop.f32.mrf.mxu0 }
 0x147   :  { %v323_v48 = vadd.f32 %v1958_v40, %v322_v47  ;;  %v824_v49 = vpack.c.bf16 %v763_v46, %v762_v44  ;;  %v1619_v44 = vld [vmem:[%s2522_s5 + $0x38] sm:$0xff]  ;;  %v114_v46 = vpack.c.bf16 %v74_v43, %v73_v42 }
 0x148   :  { %1187 = vmatpush.bf16.msra.mxu3 %v1619_v44 }
 0x149   :  { %v448_v51 = vmax.f32 %v323_v48, 0.0  ;;  %872 = vmatmul.bf16.gmra.mxu2 %v824_v49  ;;  %v1618_v48 = vld [vmem:[%s2522_s5 + $0x30] sm:$0xff] }
 0x14a   :  { %v613_v52 = vpop.f32.mrf.mxu1 }
 0x14b   :  { %v500_v55 = vpack.c.bf16 %v448_v51, %v447_v50  ;;  %v614_v58 = vadd.f32 %v2044_v3, %v613_v52  ;;  %v1617_v51 = vld [vmem:[%s2522_s5 + $0x28] sm:$0xff] }
 0x14c   :  { %1188 = vmatpush.bf16.msra.mxu3 %v1618_v48 }
 0x14d   :  { %652 = vmatmul.bf16.gmra.mxu1 %v500_v55  ;;  %v764_v61 = vmax.f32 %v614_v58, 0.0 }
 0x14e   :  { %v325_v57 = vpop.f32.mrf.mxu0 }
 0x14f   :  { %v326_v62 = vadd.f32 %v1958_v40, %v325_v57  ;;  %v1616_v57 = vld [vmem:[%s2522_s5 + $0x20] sm:$0xff] }
 0x150   :  { %1189 = vmatpush.bf16.msra.mxu3 %v1617_v51 }
 0x151   :  { %1524 = vmatmul.msk.bf16.gmra.mxu0 %vm159_vm0, %v111_v56  ;;  %v449_v4 = vmax.f32 %v326_v62, 0.0 }
 0x152   :  { %v615_v59 = vpop.f32.mrf.mxu1 }
 0x153   :  { %v616_v60 = vadd.f32 %v2044_v3, %v615_v59 }
 0x154   :  { %1190 = vmatpush.bf16.msra.mxu3 %v1616_v57 }
 0x155   :  { %v765_v63 = vmax.f32 %v616_v60, 0.0 }
 0x156   :  { %v327_v0 = vpop.f32.mrf.mxu0 }
 0x157   :  { %v328_v1 = vadd.f32 %v1958_v40, %v327_v0  ;;  %v825_v2 = vpack.c.bf16 %v765_v63, %v764_v61  ;;  %v75_v63 = vld [vmem:[%s2519_s0 + $0x180] sm:$0xff]  ;;  %v76_v0 = vld [vmem:[%s2519_s0 + $0x188] sm:$0xff] }
 0x159   :  { %v450_v5 = vmax.f32 %v328_v1, 0.0  ;;  %877 = vmatmul.bf16.gmra.mxu2 %v825_v2  ;;  %v1615_v1 = vld [vmem:[%s2522_s5 + $0x18] sm:$0xff] }
 0x15a   :  { %v618_v6 = vpop.f32.mrf.mxu1  ;;  %1191 = vmatpush.bf16.msra.mxu3 %v1615_v1 }
 0x15b   :  { %v501_v9 = vpack.c.bf16 %v450_v5, %v449_v4  ;;  %v619_v12 = vadd.f32 %v2044_v3, %v618_v6  ;;  %v115_v4 = vpack.c.bf16 %v76_v0, %v75_v63  ;;  %v1614_v6 = vld [vmem:[%s2522_s5 + $0x10] sm:$0xff]  ;;  %v82_v0 = vld [vmem:[%s2519_s0 + $0x1b8] sm:$0xff] }
 0x15c   :  { %v81_v63 = vld [vmem:[%s2519_s0 + $0x1b0] sm:$0xff] }
 0x15d   :  { %657 = vmatmul.bf16.gmra.mxu1 %v501_v9  ;;  %v766_v15 = vmax.f32 %v619_v12, 0.0  ;;  %v1613_v9 = vld [vmem:[%s2522_s5 + $0x8] sm:$0xff] }
 0x15e   :  { %v330_v11 = vpop.f32.mrf.mxu0  ;;  %1192 = vmatpush.bf16.msra.mxu3 %v1614_v6 }
 0x15f   :  { %v331_v16 = vadd.f32 %v1958_v40, %v330_v11 }
 0x161   :  { %1525 = vmatmul.msk.bf16.gmra.mxu0 %vm159_vm0, %v112_v10  ;;  %v451_v21 = vmax.f32 %v331_v16, 0.0 }
 0x162   :  { %v620_v13 = vpop.f32.mrf.mxu1  ;;  %1193 = vmatpush.bf16.msra.mxu3 %v1613_v9 }
 0x163   :  { %v621_v14 = vadd.f32 %v2044_v3, %v620_v13 }
 0x165   :  { %v767_v17 = vmax.f32 %v621_v14, 0.0 }
 0x166   :  { %v332_v18 = vpop.f32.mrf.mxu0 }
 0x167   :  { %v333_v19 = vadd.f32 %v1958_v40, %v332_v18  ;;  %v826_v20 = vpack.c.bf16 %v767_v17, %v766_v15  ;;  %v1612_v15 = vld [vmem:[%s2522_s5] sm:$0xff] }
 0x168   :  { %1194 = vmatpush.bf16.msra.mxu3 %v1612_v15 }
 0x169   :  { %v452_v22 = vmax.f32 %v333_v19, 0.0  ;;  %882 = vmatmul.bf16.gmra.mxu2 %v826_v20 }
 0x16a   :  { %v623_v23 = vpop.f32.mrf.mxu1 }
 0x16b   :  { %v502_v26 = vpack.c.bf16 %v452_v22, %v451_v21  ;;  %v624_v29 = vadd.f32 %v2044_v3, %v623_v23  ;;  %v77_v21 = vld [vmem:[%s2519_s0 + $0x190] sm:$0xff]  ;;  %v78_v22 = vld [vmem:[%s2519_s0 + $0x198] sm:$0xff] }
 0x16c   :  { %v116_v24 = vpack.c.bf16 %v78_v22, %v77_v21 }
 0x16d   :  { %662 = vmatmul.bf16.gmra.mxu1 %v502_v26  ;;  %v768_v32 = vmax.f32 %v624_v29, 0.0 }
 0x16e   :  { %v335_v28 = vpop.f32.mrf.mxu0 }
 0x16f   :  { %v336_v33 = vadd.f32 %v1958_v40, %v335_v28 }
 0x171   :  { %1526 = vmatmul.msk.bf16.gmra.mxu0 %vm159_vm0, %v113_v27  ;;  %v453_v38 = vmax.f32 %v336_v33, 0.0 }
 0x172   :  { %v625_v30 = vpop.f32.mrf.mxu1 }
 0x173   :  { %v626_v31 = vadd.f32 %v2044_v3, %v625_v30 }
 0x175   :  { %v769_v34 = vmax.f32 %v626_v31, 0.0 }
 0x176   :  { %v337_v35 = vpop.f32.mrf.mxu0 }
 0x177   :  { %v338_v36 = vadd.f32 %v1958_v40, %v337_v35  ;;  %v827_v37 = vpack.c.bf16 %v769_v34, %v768_v32 }
 0x179   :  { %v454_v39 = vmax.f32 %v338_v36, 0.0  ;;  %887 = vmatmul.bf16.gmra.mxu2 %v827_v37 }
 0x17a   :  { %v628_v41 = vpop.f32.mrf.mxu1 }
 0x17b   :  { %v503_v45 = vpack.c.bf16 %v454_v39, %v453_v38  ;;  %v629_v49 = vadd.f32 %v2044_v3, %v628_v41  ;;  %v79_v38 = vld [vmem:[%s2519_s0 + $0x1a0] sm:$0xff]  ;;  %v80_v39 = vld [vmem:[%s2519_s0 + $0x1a8] sm:$0xff] }
 0x17c   :  { %v117_v43 = vpack.c.bf16 %v80_v39, %v79_v38 }
 0x17d   :  { %667 = vmatmul.bf16.gmra.mxu1 %v503_v45  ;;  %v770_v53 = vmax.f32 %v629_v49, 0.0 }
 0x17e   :  { %v340_v47 = vpop.f32.mrf.mxu0 }
 0x17f   :  { %v341_v54 = vadd.f32 %v1958_v40, %v340_v47 }
 0x181   :  { %1527 = vmatmul.msk.bf16.gmra.mxu0 %vm159_vm0, %v114_v46  ;;  %v455_v60 = vmax.f32 %v341_v54, 0.0 }
 0x182   :  { %v630_v50 = vpop.f32.mrf.mxu1 }
 0x183   :  { %v631_v52 = vadd.f32 %v2044_v3, %v630_v50 }
 0x185   :  { %v771_v55 = vmax.f32 %v631_v52, 0.0 }
 0x186   :  { %v342_v56 = vpop.f32.mrf.mxu0 }
 0x187   :  { %v343_v58 = vadd.f32 %v1958_v40, %v342_v56  ;;  %v828_v59 = vpack.c.bf16 %v771_v55, %v770_v53 }
 0x189   :  { %v456_v61 = vmax.f32 %v343_v58, 0.0  ;;  %892 = vmatmul.bf16.gmra.mxu2 %v828_v59 }
 0x18a   :  { %v633_v62 = vpop.f32.mrf.mxu1 }
 0x18b   :  { %v504_v2 = vpack.c.bf16 %v456_v61, %v455_v60  ;;  %v634_v7 = vadd.f32 %v2044_v3, %v633_v62 }
 0x18d   :  { %672 = vmatmul.bf16.gmra.mxu1 %v504_v2  ;;  %v772_v11 = vmax.f32 %v634_v7, 0.0 }
 0x18e   :  { %v345_v5 = vpop.f32.mrf.mxu0 }
 0x18f   :  { %v346_v12 = vadd.f32 %v1958_v40, %v345_v5 }
 0x191   :  { %1528 = vmatmul.msk.bf16.gmra.mxu0 %vm159_vm0, %v115_v4  ;;  %v457_v18 = vmax.f32 %v346_v12, 0.0  ;;  %v118_v4 = vpack.c.bf16 %v82_v0, %v81_v63 }
 0x192   :  { %v635_v8 = vpop.f32.mrf.mxu1 }
 0x193   :  { %v636_v10 = vadd.f32 %v2044_v3, %v635_v8 }
 0x195   :  { %v773_v13 = vmax.f32 %v636_v10, 0.0 }
 0x196   :  { %v347_v14 = vpop.f32.mrf.mxu0 }
 0x197   :  { %v348_v16 = vadd.f32 %v1958_v40, %v347_v14  ;;  %v829_v17 = vpack.c.bf16 %v773_v13, %v772_v11 }
 0x199   :  { %v458_v19 = vmax.f32 %v348_v16, 0.0  ;;  %897 = vmatmul.bf16.gmra.mxu2 %v829_v17 }
 0x19a   :  { %v638_v20 = vpop.f32.mrf.mxu1 }
 0x19b   :  { %v505_v23 = vpack.c.bf16 %v458_v19, %v457_v18  ;;  %v639_v26 = vadd.f32 %v2044_v3, %v638_v20 }
 0x19d   :  { %677 = vmatmul.bf16.gmra.mxu1 %v505_v23  ;;  %v774_v29 = vmax.f32 %v639_v26, 0.0 }
 0x19e   :  { %v350_v25 = vpop.f32.mrf.mxu0 }
 0x19f   :  { %v351_v30 = vadd.f32 %v1958_v40, %v350_v25  ;;  %v84_v25 = vld [vmem:[%s2519_s0 + $0x1c8] sm:$0xff] }
 0x1a1   :  { %1529 = vmatmul.msk.bf16.gmra.mxu0 %vm159_vm0, %v116_v24  ;;  %v459_v35 = vmax.f32 %v351_v30, 0.0  ;;  %v83_v24 = vld [vmem:[%s2519_s0 + $0x1c0] sm:$0xff] }
 0x1a2   :  { %v640_v27 = vpop.f32.mrf.mxu1 }
 0x1a3   :  { %v641_v28 = vadd.f32 %v2044_v3, %v640_v27 }
 0x1a5   :  { %v775_v31 = vmax.f32 %v641_v28, 0.0  ;;  %v119_v28 = vpack.c.bf16 %v84_v25, %v83_v24 }
 0x1a6   :  { %v352_v32 = vpop.f32.mrf.mxu0 }
 0x1a7   :  { %v353_v33 = vadd.f32 %v1958_v40, %v352_v32  ;;  %v830_v34 = vpack.c.bf16 %v775_v31, %v774_v29 }
 0x1a9   :  { %v460_v36 = vmax.f32 %v353_v33, 0.0  ;;  %902 = vmatmul.bf16.gmra.mxu2 %v830_v34 }
 0x1aa   :  { %v643_v37 = vpop.f32.mrf.mxu1 }
 0x1ab   :  { %v506_v41 = vpack.c.bf16 %v460_v36, %v459_v35  ;;  %v644_v45 = vadd.f32 %v2044_v3, %v643_v37 }
 0x1ac   :  { %v863_v42 = vpop.f32.mrf.mxu2 }
 0x1ad   :  { %682 = vmatmul.bf16.gmra.mxu1 %v506_v41  ;;  %v864_v47 = vadd.f32 %v2044_v3, %v863_v42  ;;  %v776_v50 = vmax.f32 %v644_v45, 0.0 }
 0x1ae   :  { %v355_v44 = vpop.f32.mrf.mxu0 }
 0x1af   :  { %v356_v51 = vadd.f32 %v1958_v40, %v355_v44  ;;  %v1023_v55 = vmax.f32 %v864_v47, 0.0 }
 0x1b1   :  { %1530 = vmatmul.msk.bf16.gmra.mxu0 %vm159_vm0, %v117_v43  ;;  %v461_v59 = vmax.f32 %v356_v51, 0.0 }
 0x1b2   :  { %v645_v46 = vpop.f32.mrf.mxu1 }
 0x1b3   :  { %v646_v48 = vadd.f32 %v2044_v3, %v645_v46 }
 0x1b4   :  { %v865_v49 = vpop.f32.mrf.mxu2 }
 0x1b5   :  { %v777_v52 = vmax.f32 %v646_v48, 0.0  ;;  %v866_v53 = vadd.f32 %v2044_v3, %v865_v49  ;;  %v85_v49 = vld [vmem:[%s2519_s0 + $0x1d0] sm:$0xff] }
 0x1b6   :  { %v357_v54 = vpop.f32.mrf.mxu0 }
 0x1b7   :  { %v1024_v56 = vmax.f32 %v866_v53, 0.0  ;;  %v358_v57 = vadd.f32 %v1958_v40, %v357_v54  ;;  %v831_v58 = vpack.c.bf16 %v777_v52, %v776_v50  ;;  %v86_v50 = vld [vmem:[%s2519_s0 + $0x1d8] sm:$0xff] }
 0x1b8   :  { %v120_v53 = vpack.c.bf16 %v86_v50, %v85_v49 }
 0x1b9   :  { %v462_v60 = vmax.f32 %v358_v57, 0.0  ;;  %907 = vmatmul.bf16.gmra.mxu2 %v831_v58  ;;  %v1087_v61 = vpack.c.bf16 %v1024_v56, %v1023_v55 }
 0x1ba   :  { %v648_v62 = vpop.f32.mrf.mxu1 }
 0x1bb   :  { %1195 = vmatmul.bf16.vlgmr.msra.gmra.mxu3 %v1087_v61  ;;  %v507_v1 = vpack.c.bf16 %v462_v60, %v461_v59  ;;  %v649_v6 = vadd.f32 %v2044_v3, %v648_v62 }
 0x1bc   :  { %v868_v2 = vpop.f32.mrf.mxu2 }
 0x1bd   :  { %687 = vmatmul.bf16.gmra.mxu1 %v507_v1  ;;  %v869_v8 = vadd.f32 %v2044_v3, %v868_v2  ;;  %v778_v11 = vmax.f32 %v649_v6, 0.0 }
 0x1be   :  { %v360_v5 = vpop.f32.mrf.mxu0 }
 0x1bf   :  { %v361_v12 = vadd.f32 %v1958_v40, %v360_v5  ;;  %v1025_v16 = vmax.f32 %v869_v8, 0.0 }
 0x1c1   :  { %1531 = vmatmul.msk.bf16.gmra.mxu0 %vm159_vm0, %v118_v4  ;;  %v463_v20 = vmax.f32 %v361_v12, 0.0 }
 0x1c2   :  { %v650_v7 = vpop.f32.mrf.mxu1 }
 0x1c3   :  { %v651_v9 = vadd.f32 %v2044_v3, %v650_v7 }
 0x1c4   :  { %v870_v10 = vpop.f32.mrf.mxu2 }
 0x1c5   :  { %v779_v13 = vmax.f32 %v651_v9, 0.0  ;;  %v871_v14 = vadd.f32 %v2044_v3, %v870_v10  ;;  %v87_v10 = vld [vmem:[%s2519_s0 + $0x1e0] sm:$0xff] }
 0x1c6   :  { %v362_v15 = vpop.f32.mrf.mxu0 }
 0x1c7   :  { %v1026_v17 = vmax.f32 %v871_v14, 0.0  ;;  %v363_v18 = vadd.f32 %v1958_v40, %v362_v15  ;;  %v832_v19 = vpack.c.bf16 %v779_v13, %v778_v11  ;;  %v88_v11 = vld [vmem:[%s2519_s0 + $0x1e8] sm:$0xff] }
 0x1c8   :  { %v121_v14 = vpack.c.bf16 %v88_v11, %v87_v10 }
 0x1c9   :  { %v464_v21 = vmax.f32 %v363_v18, 0.0  ;;  %912 = vmatmul.bf16.gmra.mxu2 %v832_v19  ;;  %v1088_v22 = vpack.c.bf16 %v1026_v17, %v1025_v16 }
 0x1ca   :  { %v653_v23 = vpop.f32.mrf.mxu1 }
 0x1cb   :  { %1200 = vmatmul.bf16.gmra.mxu3 %v1088_v22  ;;  %v508_v26 = vpack.c.bf16 %v464_v21, %v463_v20  ;;  %v654_v30 = vadd.f32 %v2044_v3, %v653_v23 }
 0x1cc   :  { %v873_v27 = vpop.f32.mrf.mxu2 }
 0x1cd   :  { %692 = vmatmul.bf16.gmra.mxu1 %v508_v26  ;;  %v874_v32 = vadd.f32 %v2044_v3, %v873_v27  ;;  %v780_v35 = vmax.f32 %v654_v30, 0.0 }
 0x1ce   :  { %v365_v29 = vpop.f32.mrf.mxu0 }
 0x1cf   :  { %v366_v36 = vadd.f32 %v1958_v40, %v365_v29  ;;  %v1027_v41 = vmax.f32 %v874_v32, 0.0 }
 0x1d1   :  { %1532 = vmatmul.msk.bf16.gmra.mxu0 %vm159_vm0, %v119_v28  ;;  %v465_v45 = vmax.f32 %v366_v36, 0.0 }
 0x1d2   :  { %v655_v31 = vpop.f32.mrf.mxu1 }
 0x1d3   :  { %v656_v33 = vadd.f32 %v2044_v3, %v655_v31 }
 0x1d4   :  { %v875_v34 = vpop.f32.mrf.mxu2 }
 0x1d5   :  { %v781_v37 = vmax.f32 %v656_v33, 0.0  ;;  %v876_v38 = vadd.f32 %v2044_v3, %v875_v34  ;;  %v89_v34 = vld [vmem:[%s2519_s0 + $0x1f0] sm:$0xff] }
 0x1d6   :  { %v367_v39 = vpop.f32.mrf.mxu0 }
 0x1d7   :  { %v1028_v42 = vmax.f32 %v876_v38, 0.0  ;;  %v368_v43 = vadd.f32 %v1958_v40, %v367_v39  ;;  %v833_v44 = vpack.c.bf16 %v781_v37, %v780_v35  ;;  %v90_v35 = vld [vmem:[%s2519_s0 + $0x1f8] sm:$0xff] }
 0x1d8   :  { %v122_v38 = vpack.c.bf16 %v90_v35, %v89_v34 }
 0x1d9   :  { %v466_v46 = vmax.f32 %v368_v43, 0.0  ;;  %917 = vmatmul.bf16.gmra.mxu2 %v833_v44  ;;  %v1089_v47 = vpack.c.bf16 %v1028_v42, %v1027_v41 }
 0x1da   :  { %v658_v48 = vpop.f32.mrf.mxu1 }
 0x1db   :  { %v509_v51 = vpack.c.bf16 %v466_v46, %v465_v45  ;;  %1205 = vmatmul.bf16.gmra.mxu3 %v1089_v47  ;;  %v659_v55 = vadd.f32 %v2044_v3, %v658_v48 }
 0x1dc   :  { %v878_v52 = vpop.f32.mrf.mxu2 }
 0x1dd   :  { %697 = vmatmul.bf16.gmra.mxu1 %v509_v51  ;;  %v879_v57 = vadd.f32 %v2044_v3, %v878_v52  ;;  %v782_v60 = vmax.f32 %v659_v55, 0.0 }
 0x1de   :  { %v370_v54 = vpop.f32.mrf.mxu0 }
 0x1df   :  { %v371_v61 = vadd.f32 %v1958_v40, %v370_v54  ;;  %v1029_v1 = vmax.f32 %v879_v57, 0.0 }
 0x1e1   :  { %1533 = vmatmul.msk.bf16.gmra.mxu0 %vm159_vm0, %v120_v53  ;;  %v467_v6 = vmax.f32 %v371_v61, 0.0 }
 0x1e2   :  { %v660_v56 = vpop.f32.mrf.mxu1 }
 0x1e3   :  { %v661_v58 = vadd.f32 %v2044_v3, %v660_v56 }
 0x1e4   :  { %v880_v59 = vpop.f32.mrf.mxu2 }
 0x1e5   :  { %v783_v62 = vmax.f32 %v661_v58, 0.0  ;;  %v881_v63 = vadd.f32 %v2044_v3, %v880_v59 }
 0x1e6   :  { %v372_v0 = vpop.f32.mrf.mxu0 }
 0x1e7   :  { %v1030_v2 = vmax.f32 %v881_v63, 0.0  ;;  %v373_v4 = vadd.f32 %v1958_v40, %v372_v0  ;;  %v834_v5 = vpack.c.bf16 %v783_v62, %v782_v60 }
 0x1e9   :  { %v468_v7 = vmax.f32 %v373_v4, 0.0  ;;  %922 = vmatmul.bf16.gmra.mxu2 %v834_v5  ;;  %v1090_v8 = vpack.c.bf16 %v1030_v2, %v1029_v1 }
 0x1ea   :  { %v663_v9 = vpop.f32.mrf.mxu1 }
 0x1eb   :  { %v510_v12 = vpack.c.bf16 %v468_v7, %v467_v6  ;;  %1210 = vmatmul.bf16.gmra.mxu3 %v1090_v8  ;;  %v664_v16 = vadd.f32 %v2044_v3, %v663_v9 }
 0x1ec   :  { %v883_v13 = vpop.f32.mrf.mxu2 }
 0x1ed   :  { %702 = vmatmul.bf16.gmra.mxu1 %v510_v12  ;;  %v884_v18 = vadd.f32 %v2044_v3, %v883_v13  ;;  %v784_v21 = vmax.f32 %v664_v16, 0.0 }
 0x1ee   :  { %v375_v15 = vpop.f32.mrf.mxu0 }
 0x1ef   :  { %v376_v22 = vadd.f32 %v1958_v40, %v375_v15  ;;  %v1031_v26 = vmax.f32 %v884_v18, 0.0 }
 0x1f1   :  { %1534 = vmatmul.msk.bf16.gmra.mxu0 %vm159_vm0, %v121_v14  ;;  %v469_v30 = vmax.f32 %v376_v22, 0.0 }
 0x1f2   :  { %v665_v17 = vpop.f32.mrf.mxu1 }
 0x1f3   :  { %v666_v19 = vadd.f32 %v2044_v3, %v665_v17 }
 0x1f4   :  { %v885_v20 = vpop.f32.mrf.mxu2 }
 0x1f5   :  { %v785_v23 = vmax.f32 %v666_v19, 0.0  ;;  %v886_v24 = vadd.f32 %v2044_v3, %v885_v20 }
 0x1f6   :  { %v377_v25 = vpop.f32.mrf.mxu0 }
 0x1f7   :  { %v1032_v27 = vmax.f32 %v886_v24, 0.0  ;;  %v378_v28 = vadd.f32 %v1958_v40, %v377_v25  ;;  %v835_v29 = vpack.c.bf16 %v785_v23, %v784_v21 }
 0x1f9   :  { %v470_v31 = vmax.f32 %v378_v28, 0.0  ;;  %927 = vmatmul.bf16.gmra.mxu2 %v835_v29  ;;  %v1091_v32 = vpack.c.bf16 %v1032_v27, %v1031_v26 }
 0x1fa   :  { %v668_v33 = vpop.f32.mrf.mxu1 }
 0x1fb   :  { %v511_v36 = vpack.c.bf16 %v470_v31, %v469_v30  ;;  %1215 = vmatmul.bf16.gmra.mxu3 %v1091_v32  ;;  %v669_v41 = vadd.f32 %v2044_v3, %v668_v33  ;;  %v2255_v32 = vld [vmem:[%s2518_s2] ss:$0 sm:$0xff] }
 0x1fc   :  { %v888_v37 = vpop.f32.mrf.mxu2 }
 0x1fd   :  { %707 = vmatmul.bf16.gmra.mxu1 %v511_v36  ;;  %v889_v43 = vadd.f32 %v2044_v3, %v888_v37  ;;  %v786_v46 = vmax.f32 %v669_v41, 0.0 }
 0x1fe   :  { %v380_v39 = vpop.f32.mrf.mxu0 }
 0x1ff   :  { %v381_v47 = vadd.f32 %v1958_v40, %v380_v39  ;;  %v1033_v51 = vmax.f32 %v889_v43, 0.0 }
 0x201   :  { %1535 = vmatmul.msk.bf16.gmra.mxu0 %vm159_vm0, %v122_v38  ;;  %v471_v55 = vmax.f32 %v381_v47, 0.0 }
 0x202   :  { %v670_v42 = vpop.f32.mrf.mxu1 }
 0x203   :  { %v671_v44 = vadd.f32 %v2044_v3, %v670_v42 }
 0x204   :  { %v890_v45 = vpop.f32.mrf.mxu2 }
 0x205   :  { %v787_v48 = vmax.f32 %v671_v44, 0.0  ;;  %v891_v49 = vadd.f32 %v2044_v3, %v890_v45 }
 0x206   :  { %v382_v50 = vpop.f32.mrf.mxu0 }
 0x207   :  { %v1034_v52 = vmax.f32 %v891_v49, 0.0  ;;  %v383_v53 = vadd.f32 %v1958_v40, %v382_v50  ;;  %v836_v54 = vpack.c.bf16 %v787_v48, %v786_v46 }
 0x209   :  { %v472_v56 = vmax.f32 %v383_v53, 0.0  ;;  %932 = vmatmul.bf16.gmra.mxu2 %v836_v54  ;;  %v1092_v57 = vpack.c.bf16 %v1034_v52, %v1033_v51 }
 0x20a   :  { %v673_v58 = vpop.f32.mrf.mxu1 }
 0x20b   :  { %v512_v59 = vpack.c.bf16 %v472_v56, %v471_v55  ;;  %1220 = vmatmul.bf16.gmra.mxu3 %v1092_v57  ;;  %v674_v62 = vadd.f32 %v2044_v3, %v673_v58 }
 0x20c   :  { %v893_v60 = vpop.f32.mrf.mxu2 }
 0x20d   :  { %712 = vmatmul.bf16.gmra.mxu1 %v512_v59  ;;  %v894_v0 = vadd.f32 %v2044_v3, %v893_v60  ;;  %v788_v4 = vmax.f32 %v674_v62, 0.0 }
 0x20e   :  { %v385_v61 = vpop.f32.mrf.mxu0 }
 0x20f   :  { %v386_v5 = vadd.f32 %v1958_v40, %v385_v61  ;;  %v1035_v9 = vmax.f32 %v894_v0, 0.0 }
 0x211   :  { %v473_v13 = vmax.f32 %v386_v5, 0.0 }
 0x212   :  { %v675_v63 = vpop.f32.mrf.mxu1 }
 0x213   :  { %v676_v1 = vadd.f32 %v2044_v3, %v675_v63 }
 0x214   :  { %v895_v2 = vpop.f32.mrf.mxu2 }
 0x215   :  { %v789_v6 = vmax.f32 %v676_v1, 0.0  ;;  %v896_v7 = vadd.f32 %v2044_v3, %v895_v2  ;;  %v2269_v2 = vld [vmem:[%s2523_s6] ss:$0 sm:$0xff] }
 0x216   :  { %v387_v8 = vpop.f32.mrf.mxu0 }
 0x217   :  { %v1036_v10 = vmax.f32 %v896_v7, 0.0  ;;  %v388_v11 = vadd.f32 %v1958_v40, %v387_v8  ;;  %v837_v12 = vpack.c.bf16 %v789_v6, %v788_v4 }
 0x219   :  { %v474_v14 = vmax.f32 %v388_v11, 0.0  ;;  %937 = vmatmul.bf16.gmra.mxu2 %v837_v12  ;;  %v1093_v15 = vpack.c.bf16 %v1036_v10, %v1035_v9 }
 0x21a   :  { %v678_v16 = vpop.f32.mrf.mxu1 }
 0x21b   :  { %v513_v17 = vpack.c.bf16 %v474_v14, %v473_v13  ;;  %1225 = vmatmul.bf16.gmra.mxu3 %v1093_v15  ;;  %v679_v20 = vadd.f32 %v2044_v3, %v678_v16 }
 0x21c   :  { %v898_v18 = vpop.f32.mrf.mxu2 }
 0x21d   :  { %717 = vmatmul.bf16.gmra.mxu1 %v513_v17  ;;  %v899_v22 = vadd.f32 %v2044_v3, %v898_v18  ;;  %v790_v25 = vmax.f32 %v679_v20, 0.0 }
 0x21e   :  { %v390_v19 = vpop.f32.mrf.mxu0 }
 0x21f   :  { %v391_v26 = vadd.f32 %v1958_v40, %v390_v19  ;;  %v1037_v30 = vmax.f32 %v899_v22, 0.0 }
 0x221   :  { %v475_v35 = vmax.f32 %v391_v26, 0.0 }
 0x222   :  { %v680_v21 = vpop.f32.mrf.mxu1 }
 0x223   :  { %v681_v23 = vadd.f32 %v2044_v3, %v680_v21 }
 0x224   :  { %v900_v24 = vpop.f32.mrf.mxu2 }
 0x225   :  { %v791_v27 = vmax.f32 %v681_v23, 0.0  ;;  %v901_v28 = vadd.f32 %v2044_v3, %v900_v24 }
 0x226   :  { %v392_v29 = vpop.f32.mrf.mxu0 }
 0x227   :  { %v1038_v31 = vmax.f32 %v901_v28, 0.0  ;;  %v393_v33 = vadd.f32 %v2255_v32, %v392_v29  ;;  %v838_v34 = vpack.c.bf16 %v791_v27, %v790_v25 }
 0x229   :  { %v476_v36 = vmax.f32 %v393_v33, 0.0  ;;  %942 = vmatmul.bf16.gmra.mxu2 %v838_v34  ;;  %v1094_v37 = vpack.c.bf16 %v1038_v31, %v1037_v30 }
 0x22a   :  { %v683_v38 = vpop.f32.mrf.mxu1 }
 0x22b   :  { %v514_v40 = vpack.c.bf16 %v476_v36, %v475_v35  ;;  %1230 = vmatmul.bf16.gmra.mxu3 %v1094_v37  ;;  %v684_v42 = vadd.f32 %v2044_v3, %v683_v38 }
 0x22c   :  { %v903_v39 = vpop.f32.mrf.mxu2 }
 0x22d   :  { %722 = vmatmul.bf16.gmra.mxu1 %v514_v40  ;;  %v904_v44 = vadd.f32 %v2044_v3, %v903_v39  ;;  %v792_v47 = vmax.f32 %v684_v42, 0.0 }
 0x22e   :  { %v395_v41 = vpop.f32.mrf.mxu0 }
 0x22f   :  { %v396_v48 = vadd.f32 %v2255_v32, %v395_v41  ;;  %v1039_v52 = vmax.f32 %v904_v44, 0.0 }
 0x231   :  { %v477_v56 = vmax.f32 %v396_v48, 0.0 }
 0x232   :  { %v685_v43 = vpop.f32.mrf.mxu1 }
 0x233   :  { %v686_v45 = vadd.f32 %v2044_v3, %v685_v43 }
 0x234   :  { %v905_v46 = vpop.f32.mrf.mxu2 }
 0x235   :  { %v793_v49 = vmax.f32 %v686_v45, 0.0  ;;  %v906_v50 = vadd.f32 %v2044_v3, %v905_v46 }
 0x236   :  { %v397_v51 = vpop.f32.mrf.mxu0 }
 0x237   :  { %v1040_v53 = vmax.f32 %v906_v50, 0.0  ;;  %v398_v54 = vadd.f32 %v2255_v32, %v397_v51  ;;  %v839_v55 = vpack.c.bf16 %v793_v49, %v792_v47 }
 0x239   :  { %v478_v57 = vmax.f32 %v398_v54, 0.0  ;;  %947 = vmatmul.bf16.gmra.mxu2 %v839_v55  ;;  %v1095_v58 = vpack.c.bf16 %v1040_v53, %v1039_v52 }
 0x23a   :  { %v688_v59 = vpop.f32.mrf.mxu1 }
 0x23b   :  { %v515_v60 = vpack.c.bf16 %v478_v57, %v477_v56  ;;  %1235 = vmatmul.bf16.gmra.mxu3 %v1095_v58  ;;  %v689_v0 = vadd.f32 %v2044_v3, %v688_v59 }
 0x23c   :  { %v908_v61 = vpop.f32.mrf.mxu2 }
 0x23d   :  { %727 = vmatmul.bf16.gmra.mxu1 %v515_v60  ;;  %v909_v1 = vadd.f32 %v2044_v3, %v908_v61  ;;  %v794_v7 = vmax.f32 %v689_v0, 0.0 }
 0x23e   :  { %v400_v62 = vpop.f32.mrf.mxu0  ;;  %v1196_v63 = vpop.f32.mrf.mxu3 }
 0x23f   :  { %v401_v8 = vadd.f32 %v2255_v32, %v400_v62  ;;  %v1041_v11 = vmax.f32 %v909_v1, 0.0  ;;  %v1197_v12 = vadd.f32 %v2269_v2, %v1196_v63  ;;  %v2298_v63 = vld [vmem:[%s2521_s4] ss:$0 sm:$0xff] }
 0x241   :  { %v479_v19 = vmax.f32 %v401_v8, 0.0 }
 0x242   :  { %v690_v4 = vpop.f32.mrf.mxu1 }
 0x243   :  { %v691_v5 = vadd.f32 %v2044_v3, %v690_v4 }
 0x244   :  { %v910_v6 = vpop.f32.mrf.mxu2 }
 0x245   :  { %v795_v9 = vmax.f32 %v691_v5, 0.0  ;;  %v911_v10 = vadd.f32 %v2044_v3, %v910_v6 }
 0x246   :  { %v402_v13 = vpop.f32.mrf.mxu0  ;;  %v1198_v14 = vpop.f32.mrf.mxu3 }
 0x247   :  { %v1042_v15 = vmax.f32 %v911_v10, 0.0  ;;  %v403_v16 = vadd.f32 %v2255_v32, %v402_v13  ;;  %v1199_v17 = vadd.f32 %v2269_v2, %v1198_v14  ;;  %v840_v18 = vpack.c.bf16 %v795_v9, %v794_v7 }
 0x249   :  { %v480_v20 = vmax.f32 %v403_v16, 0.0  ;;  %v1623_v21 = vpack.c.bf16 %v1199_v17, %v1197_v12  ;;  %952 = vmatmul.bf16.gmra.mxu2 %v840_v18  ;;  %v1096_v22 = vpack.c.bf16 %v1042_v15, %v1041_v11 }
 0x24a   :  { %v693_v23 = vpop.f32.mrf.mxu1 }
 0x24b   :  { %v516_v24 = vpack.c.bf16 %v480_v20, %v479_v19  ;;  %1624 = vst [vmem:[%s2524_s7] sm:$0xff] %v1623_v21   ;;  %1240 = vmatmul.bf16.gmra.mxu3 %v1096_v22  ;;  %v694_v28 = vadd.f32 %v2044_v3, %v693_v23 }
 0x24c   :  { %v913_v25 = vpop.f32.mrf.mxu2 }
 0x24d   :  { %732 = vmatmul.bf16.gmra.mxu1 %v516_v24  ;;  %v914_v29 = vadd.f32 %v2044_v3, %v913_v25  ;;  %v796_v34 = vmax.f32 %v694_v28, 0.0 }
 0x24e   :  { %v405_v26 = vpop.f32.mrf.mxu0  ;;  %v1201_v27 = vpop.f32.mrf.mxu3 }
 0x24f   :  { %v406_v35 = vadd.f32 %v2255_v32, %v405_v26  ;;  %v1043_v38 = vmax.f32 %v914_v29, 0.0  ;;  %v1202_v40 = vadd.f32 %v2269_v2, %v1201_v27 }
 0x251   :  { %v481_v46 = vmax.f32 %v406_v35, 0.0 }
 0x252   :  { %v695_v30 = vpop.f32.mrf.mxu1 }
 0x253   :  { %v696_v31 = vadd.f32 %v2044_v3, %v695_v30 }
 0x254   :  { %v915_v33 = vpop.f32.mrf.mxu2 }
 0x255   :  { %v797_v36 = vmax.f32 %v696_v31, 0.0  ;;  %v916_v37 = vadd.f32 %v2044_v3, %v915_v33 }
 0x256   :  { %v407_v39 = vpop.f32.mrf.mxu0  ;;  %v1203_v41 = vpop.f32.mrf.mxu3 }
 0x257   :  { %v1044_v42 = vmax.f32 %v916_v37, 0.0  ;;  %v408_v43 = vadd.f32 %v2255_v32, %v407_v39  ;;  %v1204_v44 = vadd.f32 %v2269_v2, %v1203_v41  ;;  %v841_v45 = vpack.c.bf16 %v797_v36, %v796_v34 }
 0x259   :  { %v482_v47 = vmax.f32 %v408_v43, 0.0  ;;  %v1628_v48 = vpack.c.bf16 %v1204_v44, %v1202_v40  ;;  %957 = vmatmul.bf16.gmra.mxu2 %v841_v45  ;;  %v1097_v49 = vpack.c.bf16 %v1044_v42, %v1043_v38 }
 0x25a   :  { %v698_v50 = vpop.f32.mrf.mxu1 }
 0x25b   :  { %v517_v51 = vpack.c.bf16 %v482_v47, %v481_v46  ;;  %1780 = vst [vmem:[%s2524_s7 + $0x8] sm:$0xff] %v1628_v48   ;;  %1245 = vmatmul.bf16.gmra.mxu3 %v1097_v49  ;;  %v699_v55 = vadd.f32 %v2044_v3, %v698_v50 }
 0x25c   :  { %v918_v52 = vpop.f32.mrf.mxu2 }
 0x25d   :  { %737 = vmatmul.bf16.gmra.mxu1 %v517_v51  ;;  %v919_v56 = vadd.f32 %v2044_v3, %v918_v52  ;;  %v798_v60 = vmax.f32 %v699_v55, 0.0 }
 0x25e   :  { %v410_v53 = vpop.f32.mrf.mxu0  ;;  %v1206_v54 = vpop.f32.mrf.mxu3 }
 0x25f   :  { %v411_v61 = vadd.f32 %v2255_v32, %v410_v53  ;;  %v1045_v1 = vmax.f32 %v919_v56, 0.0  ;;  %v1207_v4 = vadd.f32 %v2269_v2, %v1206_v54 }
 0x261   :  { %v483_v10 = vmax.f32 %v411_v61, 0.0 }
 0x262   :  { %v700_v57 = vpop.f32.mrf.mxu1 }
 0x263   :  { %v701_v58 = vadd.f32 %v2044_v3, %v700_v57 }
 0x264   :  { %v920_v59 = vpop.f32.mrf.mxu2 }
 0x265   :  { %v799_v62 = vmax.f32 %v701_v58, 0.0  ;;  %v921_v0 = vadd.f32 %v2298_v63, %v920_v59 }
 0x266   :  { %v412_v5 = vpop.f32.mrf.mxu0  ;;  %v1208_v6 = vpop.f32.mrf.mxu3 }
 0x267   :  { %v842_v7 = vpack.c.bf16 %v799_v62, %v798_v60  ;;  %v1046_v8 = vmax.f32 %v921_v0, 0.0  ;;  %v413_v3 = vadd.f32 %v2255_v32, %v412_v5  ;;  %v1209_v9 = vadd.f32 %v2269_v2, %v1208_v6 }
 0x269   :  { %v484_v11 = vmax.f32 %v413_v3, 0.0  ;;  %v1633_v12 = vpack.c.bf16 %v1209_v9, %v1207_v4  ;;  %962 = vmatmul.bf16.gmra.mxu2 %v842_v7  ;;  %v1098_v13 = vpack.c.bf16 %v1046_v8, %v1045_v1 }
 0x26a   :  { %v703_v14 = vpop.f32.mrf.mxu1 }
 0x26b   :  { %v518_v15 = vpack.c.bf16 %v484_v11, %v483_v10  ;;  %1781 = vst [vmem:[%s2524_s7 + $0x10] sm:$0xff] %v1633_v12   ;;  %1250 = vmatmul.bf16.gmra.mxu3 %v1098_v13  ;;  %v704_v19 = vadd.f32 %v2298_v63, %v703_v14 }
 0x26c   :  { %v923_v16 = vpop.f32.mrf.mxu2 }
 0x26d   :  { %742 = vmatmul.bf16.gmra.mxu1 %v518_v15  ;;  %v924_v20 = vadd.f32 %v2298_v63, %v923_v16  ;;  %v800_v24 = vmax.f32 %v704_v19, 0.0 }
 0x26e   :  { %v415_v17 = vpop.f32.mrf.mxu0  ;;  %v1211_v18 = vpop.f32.mrf.mxu3 }
 0x26f   :  { %v416_v25 = vadd.f32 %v2255_v32, %v415_v17  ;;  %v1047_v28 = vmax.f32 %v924_v20, 0.0  ;;  %v1212_v29 = vadd.f32 %v2269_v2, %v1211_v18 }
 0x271   :  { %v485_v37 = vmax.f32 %v416_v25, 0.0 }
 0x272   :  { %v705_v21 = vpop.f32.mrf.mxu1 }
 0x273   :  { %v706_v22 = vadd.f32 %v2298_v63, %v705_v21 }
 0x274   :  { %v925_v23 = vpop.f32.mrf.mxu2 }
 0x275   :  { %v801_v26 = vmax.f32 %v706_v22, 0.0  ;;  %v926_v27 = vadd.f32 %v2298_v63, %v925_v23 }
 0x276   :  { %v417_v30 = vpop.f32.mrf.mxu0  ;;  %v1213_v31 = vpop.f32.mrf.mxu3 }
 0x277   :  { %v843_v33 = vpack.c.bf16 %v801_v26, %v800_v24  ;;  %v1048_v34 = vmax.f32 %v926_v27, 0.0  ;;  %v418_v35 = vadd.f32 %v2255_v32, %v417_v30  ;;  %v1214_v36 = vadd.f32 %v2269_v2, %v1213_v31 }
 0x279   :  { %v486_v38 = vmax.f32 %v418_v35, 0.0  ;;  %v1638_v40 = vpack.c.bf16 %v1214_v36, %v1212_v29  ;;  %967 = vmatmul.bf16.gmra.mxu2 %v843_v33  ;;  %v1099_v39 = vpack.c.bf16 %v1048_v34, %v1047_v28 }
 0x27a   :  { %v708_v41 = vpop.f32.mrf.mxu1 }
 0x27b   :  { %v519_v42 = vpack.c.bf16 %v486_v38, %v485_v37  ;;  %1782 = vst [vmem:[%s2524_s7 + $0x18] sm:$0xff] %v1638_v40   ;;  %1255 = vmatmul.bf16.gmra.mxu3 %v1099_v39  ;;  %v709_v46 = vadd.f32 %v2298_v63, %v708_v41 }
 0x27c   :  { %v928_v43 = vpop.f32.mrf.mxu2 }
 0x27d   :  { %747 = vmatmul.bf16.gmra.mxu1 %v519_v42  ;;  %v929_v47 = vadd.f32 %v2298_v63, %v928_v43  ;;  %v802_v51 = vmax.f32 %v709_v46, 0.0 }
 0x27e   :  { %v420_v44 = vpop.f32.mrf.mxu0  ;;  %v1216_v45 = vpop.f32.mrf.mxu3 }
 0x27f   :  { %v421_v52 = vadd.f32 %v2255_v32, %v420_v44  ;;  %v1049_v55 = vmax.f32 %v929_v47, 0.0  ;;  %v1217_v56 = vadd.f32 %v2269_v2, %v1216_v45 }
 0x281   :  { %v487_v0 = vmax.f32 %v421_v52, 0.0 }
 0x282   :  { %v710_v48 = vpop.f32.mrf.mxu1 }
 0x283   :  { %v711_v49 = vadd.f32 %v2298_v63, %v710_v48 }
 0x284   :  { %v930_v50 = vpop.f32.mrf.mxu2 }
 0x285   :  { %v803_v53 = vmax.f32 %v711_v49, 0.0  ;;  %v931_v54 = vadd.f32 %v2298_v63, %v930_v50 }
 0x286   :  { %v422_v57 = vpop.f32.mrf.mxu0  ;;  %v1218_v58 = vpop.f32.mrf.mxu3 }
 0x287   :  { %v844_v59 = vpack.c.bf16 %v803_v53, %v802_v51  ;;  %v1050_v60 = vmax.f32 %v931_v54, 0.0  ;;  %v423_v61 = vadd.f32 %v2255_v32, %v422_v57  ;;  %v1219_v62 = vadd.f32 %v2269_v2, %v1218_v58 }
 0x289   :  { %v488_v1 = vmax.f32 %v423_v61, 0.0  ;;  %v1643_v4 = vpack.c.bf16 %v1219_v62, %v1217_v56  ;;  %972 = vmatmul.bf16.gmra.mxu2 %v844_v59  ;;  %v1100_v5 = vpack.c.bf16 %v1050_v60, %v1049_v55 }
 0x28a   :  { %v713_v6 = vpop.f32.mrf.mxu1 }
 0x28b   :  { %v520_v7 = vpack.c.bf16 %v488_v1, %v487_v0  ;;  %1783 = vst [vmem:[%s2524_s7 + $0x20] sm:$0xff] %v1643_v4   ;;  %1260 = vmatmul.bf16.gmra.mxu3 %v1100_v5  ;;  %v714_v9 = vadd.f32 %v2298_v63, %v713_v6 }
 0x28c   :  { %v933_v8 = vpop.f32.mrf.mxu2 }
 0x28d   :  { %752 = vmatmul.bf16.gmra.mxu1 %v520_v7  ;;  %v934_v32 = vadd.f32 %v2298_v63, %v933_v8  ;;  %v804_v13 = vmax.f32 %v714_v9, 0.0 }
 0x28e   :  { %v1221_v3 = vpop.f32.mrf.mxu3 }
 0x28f   :  { %v1051_v16 = vmax.f32 %v934_v32, 0.0  ;;  %v1222_v18 = vadd.f32 %v2269_v2, %v1221_v3 }
 0x292   :  { %v715_v10 = vpop.f32.mrf.mxu1 }
 0x293   :  { %v716_v11 = vadd.f32 %v2298_v63, %v715_v10 }
 0x294   :  { %v935_v12 = vpop.f32.mrf.mxu2 }
 0x295   :  { %v805_v14 = vmax.f32 %v716_v11, 0.0  ;;  %v936_v15 = vadd.f32 %v2298_v63, %v935_v12 }
 0x296   :  { %v1223_v17 = vpop.f32.mrf.mxu3 }
 0x297   :  { %v845_v19 = vpack.c.bf16 %v805_v14, %v804_v13  ;;  %v1052_v20 = vmax.f32 %v936_v15, 0.0  ;;  %v1224_v21 = vadd.f32 %v2269_v2, %v1223_v17 }
 0x299   :  { %v1648_v22 = vpack.c.bf16 %v1224_v21, %v1222_v18  ;;  %977 = vmatmul.bf16.gmra.mxu2 %v845_v19  ;;  %v1101_v23 = vpack.c.bf16 %v1052_v20, %v1051_v16 }
 0x29a   :  { %v718_v24 = vpop.f32.mrf.mxu1 }
 0x29b   :  { %1784 = vst [vmem:[%s2524_s7 + $0x28] sm:$0xff] %v1648_v22   ;;  %1265 = vmatmul.bf16.gmra.mxu3 %v1101_v23  ;;  %v719_v27 = vadd.f32 %v2298_v63, %v718_v24 }
 0x29c   :  { %v938_v25 = vpop.f32.mrf.mxu2 }
 0x29d   :  { %v939_v28 = vadd.f32 %v2298_v63, %v938_v25  ;;  %v806_v33 = vmax.f32 %v719_v27, 0.0 }
 0x29e   :  { %v1226_v26 = vpop.f32.mrf.mxu3 }
 0x29f   :  { %v1053_v36 = vmax.f32 %v939_v28, 0.0  ;;  %v1227_v38 = vadd.f32 %v2269_v2, %v1226_v26 }
 0x2a2   :  { %v720_v29 = vpop.f32.mrf.mxu1 }
 0x2a3   :  { %v721_v30 = vadd.f32 %v2298_v63, %v720_v29 }
 0x2a4   :  { %v940_v31 = vpop.f32.mrf.mxu2 }
 0x2a5   :  { %v807_v34 = vmax.f32 %v721_v30, 0.0  ;;  %v941_v35 = vadd.f32 %v2298_v63, %v940_v31 }
 0x2a6   :  { %v1228_v37 = vpop.f32.mrf.mxu3 }
 0x2a7   :  { %v846_v40 = vpack.c.bf16 %v807_v34, %v806_v33  ;;  %v1054_v39 = vmax.f32 %v941_v35, 0.0  ;;  %v1229_v41 = vadd.f32 %v2269_v2, %v1228_v37 }
 0x2a9   :  { %v1653_v42 = vpack.c.bf16 %v1229_v41, %v1227_v38  ;;  %982 = vmatmul.bf16.gmra.mxu2 %v846_v40  ;;  %v1102_v43 = vpack.c.bf16 %v1054_v39, %v1053_v36 }
 0x2aa   :  { %v723_v44 = vpop.f32.mrf.mxu1 }
 0x2ab   :  { %1785 = vst [vmem:[%s2524_s7 + $0x30] sm:$0xff] %v1653_v42   ;;  %1270 = vmatmul.bf16.gmra.mxu3 %v1102_v43  ;;  %v724_v47 = vadd.f32 %v2298_v63, %v723_v44 }
 0x2ac   :  { %v943_v45 = vpop.f32.mrf.mxu2 }
 0x2ad   :  { %v944_v48 = vadd.f32 %v2298_v63, %v943_v45  ;;  %v808_v52 = vmax.f32 %v724_v47, 0.0 }
 0x2ae   :  { %v1231_v46 = vpop.f32.mrf.mxu3 }
 0x2af   :  { %v1055_v55 = vmax.f32 %v944_v48, 0.0  ;;  %v1232_v57 = vadd.f32 %v2269_v2, %v1231_v46 }
 0x2b2   :  { %v725_v49 = vpop.f32.mrf.mxu1 }
 0x2b3   :  { %v726_v50 = vadd.f32 %v2298_v63, %v725_v49 }
 0x2b4   :  { %v945_v51 = vpop.f32.mrf.mxu2 }
 0x2b5   :  { %v809_v53 = vmax.f32 %v726_v50, 0.0  ;;  %v946_v54 = vadd.f32 %v2298_v63, %v945_v51 }
 0x2b6   :  { %v1233_v56 = vpop.f32.mrf.mxu3 }
 0x2b7   :  { %v847_v58 = vpack.c.bf16 %v809_v53, %v808_v52  ;;  %v1056_v59 = vmax.f32 %v946_v54, 0.0  ;;  %v1234_v60 = vadd.f32 %v2269_v2, %v1233_v56 }
 0x2b9   :  { %v1658_v61 = vpack.c.bf16 %v1234_v60, %v1232_v57  ;;  %987 = vmatmul.bf16.gmra.mxu2 %v847_v58  ;;  %v1103_v62 = vpack.c.bf16 %v1056_v59, %v1055_v55 }
 0x2ba   :  { %v728_v0 = vpop.f32.mrf.mxu1 }
 0x2bb   :  { %1786 = vst [vmem:[%s2524_s7 + $0x38] sm:$0xff] %v1658_v61   ;;  %1275 = vmatmul.bf16.gmra.mxu3 %v1103_v62  ;;  %v729_v5 = vadd.f32 %v2298_v63, %v728_v0 }
 0x2bc   :  { %v948_v1 = vpop.f32.mrf.mxu2 }
 0x2bd   :  { %v949_v6 = vadd.f32 %v2298_v63, %v948_v1  ;;  %v810_v9 = vmax.f32 %v729_v5, 0.0 }
 0x2be   :  { %v1236_v4 = vpop.f32.mrf.mxu3 }
 0x2bf   :  { %v1057_v11 = vmax.f32 %v949_v6, 0.0  ;;  %v1237_v13 = vadd.f32 %v2269_v2, %v1236_v4 }
 0x2c2   :  { %v730_v7 = vpop.f32.mrf.mxu1 }
 0x2c3   :  { %v731_v8 = vadd.f32 %v2298_v63, %v730_v7 }
 0x2c4   :  { %v950_v3 = vpop.f32.mrf.mxu2 }
 0x2c5   :  { %v811_v32 = vmax.f32 %v731_v8, 0.0  ;;  %v951_v10 = vadd.f32 %v2298_v63, %v950_v3 }
 0x2c6   :  { %v1238_v12 = vpop.f32.mrf.mxu3 }
 0x2c7   :  { %v848_v14 = vpack.c.bf16 %v811_v32, %v810_v9  ;;  %v1058_v15 = vmax.f32 %v951_v10, 0.0  ;;  %v1239_v16 = vadd.f32 %v2269_v2, %v1238_v12 }
 0x2c9   :  { %v1663_v17 = vpack.c.bf16 %v1239_v16, %v1237_v13  ;;  %992 = vmatmul.bf16.gmra.mxu2 %v848_v14  ;;  %v1104_v18 = vpack.c.bf16 %v1058_v15, %v1057_v11 }
 0x2ca   :  { %v733_v19 = vpop.f32.mrf.mxu1 }
 0x2cb   :  { %1787 = vst [vmem:[%s2524_s7 + $0x40] sm:$0xff] %v1663_v17   ;;  %1280 = vmatmul.bf16.gmra.mxu3 %v1104_v18  ;;  %v734_v22 = vadd.f32 %v2298_v63, %v733_v19 }
 0x2cc   :  { %v953_v20 = vpop.f32.mrf.mxu2 }
 0x2cd   :  { %v954_v23 = vadd.f32 %v2298_v63, %v953_v20  ;;  %v812_v27 = vmax.f32 %v734_v22, 0.0 }
 0x2ce   :  { %v1241_v21 = vpop.f32.mrf.mxu3 }
 0x2cf   :  { %v1059_v30 = vmax.f32 %v954_v23, 0.0  ;;  %v1242_v33 = vadd.f32 %v2269_v2, %v1241_v21 }
 0x2d2   :  { %v735_v24 = vpop.f32.mrf.mxu1 }
 0x2d3   :  { %v736_v25 = vadd.f32 %v2298_v63, %v735_v24 }
 0x2d4   :  { %v955_v26 = vpop.f32.mrf.mxu2 }
 0x2d5   :  { %v813_v28 = vmax.f32 %v736_v25, 0.0  ;;  %v956_v29 = vadd.f32 %v2298_v63, %v955_v26 }
 0x2d6   :  { %v1243_v31 = vpop.f32.mrf.mxu3 }
 0x2d7   :  { %v849_v34 = vpack.c.bf16 %v813_v28, %v812_v27  ;;  %v1060_v35 = vmax.f32 %v956_v29, 0.0  ;;  %v1244_v36 = vadd.f32 %v2269_v2, %v1243_v31 }
 0x2d9   :  { %v1668_v37 = vpack.c.bf16 %v1244_v36, %v1242_v33  ;;  %997 = vmatmul.bf16.gmra.mxu2 %v849_v34  ;;  %v1105_v38 = vpack.c.bf16 %v1060_v35, %v1059_v30 }
 0x2da   :  { %v738_v40 = vpop.f32.mrf.mxu1 }
 0x2db   :  { %1788 = vst [vmem:[%s2524_s7 + $0x48] sm:$0xff] %v1668_v37   ;;  %1285 = vmatmul.bf16.gmra.mxu3 %v1105_v38  ;;  %v739_v42 = vadd.f32 %v2298_v63, %v738_v40 }
 0x2dc   :  { %v958_v39 = vpop.f32.mrf.mxu2 }
 0x2dd   :  { %v959_v43 = vadd.f32 %v2298_v63, %v958_v39  ;;  %v814_v47 = vmax.f32 %v739_v42, 0.0 }
 0x2de   :  { %v1246_v41 = vpop.f32.mrf.mxu3 }
 0x2df   :  { %v1061_v50 = vmax.f32 %v959_v43, 0.0  ;;  %v1247_v52 = vadd.f32 %v2269_v2, %v1246_v41 }
 0x2e2   :  { %v740_v44 = vpop.f32.mrf.mxu1 }
 0x2e3   :  { %v741_v45 = vadd.f32 %v2298_v63, %v740_v44 }
 0x2e4   :  { %v960_v46 = vpop.f32.mrf.mxu2 }
 0x2e5   :  { %v815_v48 = vmax.f32 %v741_v45, 0.0  ;;  %v961_v49 = vadd.f32 %v2298_v63, %v960_v46 }
 0x2e6   :  { %v1248_v51 = vpop.f32.mrf.mxu3 }
 0x2e7   :  { %v850_v53 = vpack.c.bf16 %v815_v48, %v814_v47  ;;  %v1062_v54 = vmax.f32 %v961_v49, 0.0  ;;  %v1249_v55 = vadd.f32 %v2269_v2, %v1248_v51 }
 0x2e9   :  { %v1673_v56 = vpack.c.bf16 %v1249_v55, %v1247_v52  ;;  %1002 = vmatmul.bf16.gmra.mxu2 %v850_v53  ;;  %v1106_v57 = vpack.c.bf16 %v1062_v54, %v1061_v50 }
 0x2ea   :  { %v743_v58 = vpop.f32.mrf.mxu1 }
 0x2eb   :  { %1789 = vst [vmem:[%s2524_s7 + $0x50] sm:$0xff] %v1673_v56   ;;  %1290 = vmatmul.bf16.gmra.mxu3 %v1106_v57  ;;  %v744_v61 = vadd.f32 %v2298_v63, %v743_v58 }
 0x2ec   :  { %v963_v59 = vpop.f32.mrf.mxu2 }
 0x2ed   :  { %v964_v62 = vadd.f32 %v2298_v63, %v963_v59  ;;  %v816_v5 = vmax.f32 %v744_v61, 0.0 }
 0x2ee   :  { %v1251_v60 = vpop.f32.mrf.mxu3 }
 0x2ef   :  { %v1063_v8 = vmax.f32 %v964_v62, 0.0  ;;  %v1252_v9 = vadd.f32 %v2269_v2, %v1251_v60 }
 0x2f2   :  { %v745_v0 = vpop.f32.mrf.mxu1 }
 0x2f3   :  { %v746_v1 = vadd.f32 %v2298_v63, %v745_v0 }
 0x2f4   :  { %v965_v4 = vpop.f32.mrf.mxu2 }
 0x2f5   :  { %v817_v6 = vmax.f32 %v746_v1, 0.0  ;;  %v966_v7 = vadd.f32 %v2298_v63, %v965_v4 }
 0x2f6   :  { %v1253_v3 = vpop.f32.mrf.mxu3 }
 0x2f7   :  { %v851_v32 = vpack.c.bf16 %v817_v6, %v816_v5  ;;  %v1064_v10 = vmax.f32 %v966_v7, 0.0  ;;  %v1254_v11 = vadd.f32 %v2269_v2, %v1253_v3 }
 0x2f9   :  { %v1107_v12 = vpack.c.bf16 %v1064_v10, %v1063_v8  ;;  %v1678_v13 = vpack.c.bf16 %v1254_v11, %v1252_v9  ;;  %1007 = vmatmul.bf16.gmra.mxu2 %v851_v32 }
 0x2fa   :  { %v748_v14 = vpop.f32.mrf.mxu1 }
 0x2fb   :  { %1790 = vst [vmem:[%s2524_s7 + $0x58] sm:$0xff] %v1678_v13   ;;  %1295 = vmatmul.bf16.gmra.mxu3 %v1107_v12  ;;  %v749_v17 = vadd.f32 %v2298_v63, %v748_v14 }
 0x2fc   :  { %v968_v15 = vpop.f32.mrf.mxu2 }
 0x2fd   :  { %v969_v18 = vadd.f32 %v2298_v63, %v968_v15  ;;  %v818_v22 = vmax.f32 %v749_v17, 0.0 }
 0x2fe   :  { %v1256_v16 = vpop.f32.mrf.mxu3 }
 0x2ff   :  { %v1065_v25 = vmax.f32 %v969_v18, 0.0  ;;  %v1257_v27 = vadd.f32 %v2269_v2, %v1256_v16 }
 0x302   :  { %v750_v19 = vpop.f32.mrf.mxu1 }
 0x303   :  { %v751_v20 = vadd.f32 %v2298_v63, %v750_v19 }
 0x304   :  { %v970_v21 = vpop.f32.mrf.mxu2 }
 0x305   :  { %v819_v23 = vmax.f32 %v751_v20, 0.0  ;;  %v971_v24 = vadd.f32 %v2298_v63, %v970_v21 }
 0x306   :  { %v1258_v26 = vpop.f32.mrf.mxu3 }
 0x307   :  { %v852_v28 = vpack.c.bf16 %v819_v23, %v818_v22  ;;  %v1066_v29 = vmax.f32 %v971_v24, 0.0  ;;  %v1259_v30 = vadd.f32 %v2269_v2, %v1258_v26 }
 0x309   :  { %v1108_v31 = vpack.c.bf16 %v1066_v29, %v1065_v25  ;;  %v1683_v33 = vpack.c.bf16 %v1259_v30, %v1257_v27  ;;  %1012 = vmatmul.bf16.gmra.mxu2 %v852_v28 }
 0x30a   :  { %v753_v34 = vpop.f32.mrf.mxu1 }
 0x30b   :  { %1791 = vst [vmem:[%s2524_s7 + $0x60] sm:$0xff] %v1683_v33   ;;  %1300 = vmatmul.bf16.gmra.mxu3 %v1108_v31  ;;  %v754_v37 = vadd.f32 %v2298_v63, %v753_v34 }
 0x30c   :  { %v973_v35 = vpop.f32.mrf.mxu2 }
 0x30d   :  { %v974_v38 = vadd.f32 %v2298_v63, %v973_v35  ;;  %v820_v42 = vmax.f32 %v754_v37, 0.0 }
 0x30e   :  { %v1261_v36 = vpop.f32.mrf.mxu3 }
 0x30f   :  { %v1067_v45 = vmax.f32 %v974_v38, 0.0  ;;  %v1262_v47 = vadd.f32 %v2269_v2, %v1261_v36 }
 0x312   :  { %v755_v40 = vpop.f32.mrf.mxu1 }
 0x313   :  { %v756_v39 = vadd.f32 %v2298_v63, %v755_v40 }
 0x314   :  { %v975_v41 = vpop.f32.mrf.mxu2 }
 0x315   :  { %v821_v43 = vmax.f32 %v756_v39, 0.0  ;;  %v976_v44 = vadd.f32 %v2298_v63, %v975_v41 }
 0x316   :  { %v1263_v46 = vpop.f32.mrf.mxu3 }
 0x317   :  { %v853_v48 = vpack.c.bf16 %v821_v43, %v820_v42  ;;  %v1068_v49 = vmax.f32 %v976_v44, 0.0  ;;  %v1264_v50 = vadd.f32 %v2269_v2, %v1263_v46 }
 0x319   :  { %v1109_v51 = vpack.c.bf16 %v1068_v49, %v1067_v45  ;;  %v1688_v52 = vpack.c.bf16 %v1264_v50, %v1262_v47  ;;  %1017 = vmatmul.bf16.gmra.mxu2 %v853_v48 }
 0x31b   :  { %1792 = vst [vmem:[%s2524_s7 + $0x68] sm:$0xff] %v1688_v52   ;;  %1305 = vmatmul.bf16.gmra.mxu3 %v1109_v51 }
 0x31c   :  { %v978_v53 = vpop.f32.mrf.mxu2 }
 0x31d   :  { %v979_v55 = vadd.f32 %v2298_v63, %v978_v53 }
 0x31e   :  { %v1266_v54 = vpop.f32.mrf.mxu3 }
 0x31f   :  { %v1069_v59 = vmax.f32 %v979_v55, 0.0  ;;  %v1267_v60 = vadd.f32 %v2269_v2, %v1266_v54 }
 0x324   :  { %v980_v56 = vpop.f32.mrf.mxu2 }
 0x325   :  { %v981_v57 = vadd.f32 %v2298_v63, %v980_v56 }
 0x326   :  { %v1268_v58 = vpop.f32.mrf.mxu3 }
 0x327   :  { %v1070_v61 = vmax.f32 %v981_v57, 0.0  ;;  %v1269_v62 = vadd.f32 %v2269_v2, %v1268_v58 }
 0x329   :  { %v1110_v0 = vpack.c.bf16 %v1070_v61, %v1069_v59  ;;  %v1693_v1 = vpack.c.bf16 %v1269_v62, %v1267_v60 }
 0x32b   :  { %1793 = vst [vmem:[%s2524_s7 + $0x70] sm:$0xff] %v1693_v1   ;;  %1310 = vmatmul.bf16.gmra.mxu3 %v1110_v0 }
 0x32c   :  { %v983_v4 = vpop.f32.mrf.mxu2 }
 0x32d   :  { %v984_v6 = vadd.f32 %v2298_v63, %v983_v4 }
 0x32e   :  { %v1271_v5 = vpop.f32.mrf.mxu3 }
 0x32f   :  { %v1071_v9 = vmax.f32 %v984_v6, 0.0  ;;  %v1272_v32 = vadd.f32 %v2269_v2, %v1271_v5 }
 0x334   :  { %v985_v7 = vpop.f32.mrf.mxu2 }
 0x335   :  { %v986_v8 = vadd.f32 %v2298_v63, %v985_v7 }
 0x336   :  { %v1273_v3 = vpop.f32.mrf.mxu3 }
 0x337   :  { %v1072_v10 = vmax.f32 %v986_v8, 0.0  ;;  %v1274_v11 = vadd.f32 %v2269_v2, %v1273_v3 }
 0x339   :  { %v1111_v12 = vpack.c.bf16 %v1072_v10, %v1071_v9  ;;  %v1698_v13 = vpack.c.bf16 %v1274_v11, %v1272_v32 }
 0x33b   :  { %1794 = vst [vmem:[%s2524_s7 + $0x78] sm:$0xff] %v1698_v13   ;;  %1315 = vmatmul.bf16.gmra.mxu3 %v1111_v12 }
 0x33c   :  { %v988_v14 = vpop.f32.mrf.mxu2 }
 0x33d   :  { %v989_v16 = vadd.f32 %v2298_v63, %v988_v14 }
 0x33e   :  { %v1276_v15 = vpop.f32.mrf.mxu3 }
 0x33f   :  { %v1073_v20 = vmax.f32 %v989_v16, 0.0  ;;  %v1277_v21 = vadd.f32 %v2269_v2, %v1276_v15 }
 0x344   :  { %v990_v17 = vpop.f32.mrf.mxu2 }
 0x345   :  { %v991_v18 = vadd.f32 %v2298_v63, %v990_v17 }
 0x346   :  { %v1278_v19 = vpop.f32.mrf.mxu3 }
 0x347   :  { %v1074_v22 = vmax.f32 %v991_v18, 0.0  ;;  %v1279_v23 = vadd.f32 %v2269_v2, %v1278_v19 }
 0x349   :  { %v1112_v24 = vpack.c.bf16 %v1074_v22, %v1073_v20  ;;  %v1703_v25 = vpack.c.bf16 %v1279_v23, %v1277_v21 }
 0x34b   :  { %1795 = vst [vmem:[%s2524_s7 + $0x80] sm:$0xff] %v1703_v25   ;;  %1320 = vmatmul.bf16.gmra.mxu3 %v1112_v24 }
 0x34c   :  { %v993_v26 = vpop.f32.mrf.mxu2 }
 0x34d   :  { %v994_v28 = vadd.f32 %v2298_v63, %v993_v26 }
 0x34e   :  { %v1281_v27 = vpop.f32.mrf.mxu3 }
 0x34f   :  { %v1075_v33 = vmax.f32 %v994_v28, 0.0  ;;  %v1282_v34 = vadd.f32 %v2269_v2, %v1281_v27 }
 0x354   :  { %v995_v29 = vpop.f32.mrf.mxu2 }
 0x355   :  { %v996_v30 = vadd.f32 %v2298_v63, %v995_v29 }
 0x356   :  { %v1283_v31 = vpop.f32.mrf.mxu3 }
 0x357   :  { %v1076_v35 = vmax.f32 %v996_v30, 0.0  ;;  %v1284_v36 = vadd.f32 %v2269_v2, %v1283_v31 }
 0x359   :  { %v1113_v37 = vpack.c.bf16 %v1076_v35, %v1075_v33  ;;  %v1708_v38 = vpack.c.bf16 %v1284_v36, %v1282_v34 }
 0x35b   :  { %1796 = vst [vmem:[%s2524_s7 + $0x88] sm:$0xff] %v1708_v38   ;;  %1325 = vmatmul.bf16.gmra.mxu3 %v1113_v37 }
 0x35c   :  { %v998_v40 = vpop.f32.mrf.mxu2 }
 0x35d   :  { %v999_v41 = vadd.f32 %v2298_v63, %v998_v40 }
 0x35e   :  { %v1286_v39 = vpop.f32.mrf.mxu3 }
 0x35f   :  { %v1077_v45 = vmax.f32 %v999_v41, 0.0  ;;  %v1287_v46 = vadd.f32 %v2269_v2, %v1286_v39 }
 0x364   :  { %v1000_v42 = vpop.f32.mrf.mxu2 }
 0x365   :  { %v1001_v43 = vadd.f32 %v2298_v63, %v1000_v42 }
 0x366   :  { %v1288_v44 = vpop.f32.mrf.mxu3 }
 0x367   :  { %v1078_v47 = vmax.f32 %v1001_v43, 0.0  ;;  %v1289_v48 = vadd.f32 %v2269_v2, %v1288_v44 }
 0x369   :  { %v1114_v49 = vpack.c.bf16 %v1078_v47, %v1077_v45  ;;  %v1713_v50 = vpack.c.bf16 %v1289_v48, %v1287_v46 }
 0x36b   :  { %1797 = vst [vmem:[%s2524_s7 + $0x90] sm:$0xff] %v1713_v50   ;;  %1330 = vmatmul.bf16.gmra.mxu3 %v1114_v49 }
 0x36c   :  { %v1003_v51 = vpop.f32.mrf.mxu2 }
 0x36d   :  { %v1004_v53 = vadd.f32 %v2298_v63, %v1003_v51 }
 0x36e   :  { %v1291_v52 = vpop.f32.mrf.mxu3 }
 0x36f   :  { %v1079_v57 = vmax.f32 %v1004_v53, 0.0  ;;  %v1292_v58 = vadd.f32 %v2269_v2, %v1291_v52 }
 0x374   :  { %v1005_v54 = vpop.f32.mrf.mxu2 }
 0x375   :  { %v1006_v55 = vadd.f32 %v2298_v63, %v1005_v54 }
 0x376   :  { %v1293_v56 = vpop.f32.mrf.mxu3 }
 0x377   :  { %v1080_v59 = vmax.f32 %v1006_v55, 0.0  ;;  %v1294_v60 = vadd.f32 %v2269_v2, %v1293_v56 }
 0x379   :  { %v1115_v61 = vpack.c.bf16 %v1080_v59, %v1079_v57  ;;  %v1718_v62 = vpack.c.bf16 %v1294_v60, %v1292_v58 }
 0x37b   :  { %1798 = vst [vmem:[%s2524_s7 + $0x98] sm:$0xff] %v1718_v62   ;;  %1335 = vmatmul.bf16.gmra.mxu3 %v1115_v61 }
 0x37c   :  { %v1008_v0 = vpop.f32.mrf.mxu2 }
 0x37d   :  { %v1009_v4 = vadd.f32 %v2298_v63, %v1008_v0 }
 0x37e   :  { %v1296_v1 = vpop.f32.mrf.mxu3 }
 0x37f   :  { %v1081_v8 = vmax.f32 %v1009_v4, 0.0  ;;  %v1297_v3 = vadd.f32 %v2269_v2, %v1296_v1 }
 0x384   :  { %v1010_v5 = vpop.f32.mrf.mxu2 }
 0x385   :  { %v1011_v6 = vadd.f32 %v2298_v63, %v1010_v5 }
 0x386   :  { %v1298_v7 = vpop.f32.mrf.mxu3 }
 0x387   :  { %v1082_v9 = vmax.f32 %v1011_v6, 0.0  ;;  %v1299_v32 = vadd.f32 %v2269_v2, %v1298_v7 }
 0x389   :  { %v1116_v10 = vpack.c.bf16 %v1082_v9, %v1081_v8  ;;  %v1723_v11 = vpack.c.bf16 %v1299_v32, %v1297_v3 }
 0x38b   :  { %1799 = vst [vmem:[%s2524_s7 + $0xa0] sm:$0xff] %v1723_v11   ;;  %1340 = vmatmul.bf16.gmra.mxu3 %v1116_v10  ;;  %v1816_v10 = vld [vmem:[%s2523_s6] ss:$0 sm:$0xff] }
 0x38c   :  { %v1013_v12 = vpop.f32.mrf.mxu2 }
 0x38d   :  { %v1014_v14 = vadd.f32 %v2298_v63, %v1013_v12 }
 0x38e   :  { %v1301_v13 = vpop.f32.mrf.mxu3 }
 0x38f   :  { %v1083_v18 = vmax.f32 %v1014_v14, 0.0  ;;  %v1302_v19 = vadd.f32 %v2269_v2, %v1301_v13 }
 0x394   :  { %v1015_v15 = vpop.f32.mrf.mxu2 }
 0x395   :  { %v1016_v16 = vadd.f32 %v2298_v63, %v1015_v15 }
 0x396   :  { %v1303_v17 = vpop.f32.mrf.mxu3 }
 0x397   :  { %v1084_v20 = vmax.f32 %v1016_v16, 0.0  ;;  %v1304_v21 = vadd.f32 %v2269_v2, %v1303_v17 }
 0x399   :  { %v1117_v22 = vpack.c.bf16 %v1084_v20, %v1083_v18  ;;  %v1728_v23 = vpack.c.bf16 %v1304_v21, %v1302_v19 }
 0x39b   :  { %1800 = vst [vmem:[%s2524_s7 + $0xa8] sm:$0xff] %v1728_v23   ;;  %1345 = vmatmul.bf16.gmra.mxu3 %v1117_v22 }
 0x39c   :  { %v1018_v24 = vpop.f32.mrf.mxu2 }
 0x39d   :  { %v1019_v26 = vadd.f32 %v2298_v63, %v1018_v24 }
 0x39e   :  { %v1306_v25 = vpop.f32.mrf.mxu3 }
 0x39f   :  { %v1085_v30 = vmax.f32 %v1019_v26, 0.0  ;;  %v1307_v31 = vadd.f32 %v2269_v2, %v1306_v25 }
 0x3a4   :  { %v1020_v27 = vpop.f32.mrf.mxu2 }
 0x3a5   :  { %v1021_v28 = vadd.f32 %v2298_v63, %v1020_v27 }
 0x3a6   :  { %v1308_v29 = vpop.f32.mrf.mxu3 }
 0x3a7   :  { %v1086_v33 = vmax.f32 %v1021_v28, 0.0  ;;  %v1309_v34 = vadd.f32 %v2269_v2, %v1308_v29 }
 0x3a9   :  { %v1118_v35 = vpack.c.bf16 %v1086_v33, %v1085_v30  ;;  %v1733_v36 = vpack.c.bf16 %v1309_v34, %v1307_v31 }
 0x3ab   :  { %1801 = vst [vmem:[%s2524_s7 + $0xb0] sm:$0xff] %v1733_v36   ;;  %1350 = vmatmul.bf16.gmra.mxu3 %v1118_v35 }
 0x3ae   :  { %v1311_v37 = vpop.f32.mrf.mxu3 }
 0x3af   :  { %v1312_v40 = vadd.f32 %v2269_v2, %v1311_v37 }
 0x3b6   :  { %v1313_v38 = vpop.f32.mrf.mxu3 }
 0x3b7   :  { %v1314_v63 = vadd.f32 %v2269_v2, %v1313_v38 }
 0x3b9   :  { %v1738_v39 = vpack.c.bf16 %v1314_v63, %v1312_v40 }
 0x3bb   :  { %1802 = vst [vmem:[%s2524_s7 + $0xb8] sm:$0xff] %v1738_v39  }
 0x3be   :  { %v1316_v41 = vpop.f32.mrf.mxu3 }
 0x3bf   :  { %v1317_v43 = vadd.f32 %v2269_v2, %v1316_v41 }
 0x3c6   :  { %v1318_v42 = vpop.f32.mrf.mxu3 }
 0x3c7   :  { %v1319_v44 = vadd.f32 %v2269_v2, %v1318_v42 }
 0x3c9   :  { %v1743_v45 = vpack.c.bf16 %v1319_v44, %v1317_v43 }
 0x3cb   :  { %1803 = vst [vmem:[%s2524_s7 + $0xc0] sm:$0xff] %v1743_v45  }
 0x3ce   :  { %v1321_v46 = vpop.f32.mrf.mxu3 }
 0x3cf   :  { %v1322_v48 = vadd.f32 %v2269_v2, %v1321_v46 }
 0x3d6   :  { %v1323_v47 = vpop.f32.mrf.mxu3 }
 0x3d7   :  { %v1324_v49 = vadd.f32 %v2269_v2, %v1323_v47 }
 0x3d9   :  { %v1748_v50 = vpack.c.bf16 %v1324_v49, %v1322_v48 }
 0x3db   :  { %1804 = vst [vmem:[%s2524_s7 + $0xc8] sm:$0xff] %v1748_v50  }
 0x3de   :  { %v1326_v51 = vpop.f32.mrf.mxu3 }
 0x3df   :  { %v1327_v53 = vadd.f32 %v2269_v2, %v1326_v51 }
 0x3e6   :  { %v1328_v52 = vpop.f32.mrf.mxu3 }
 0x3e7   :  { %v1329_v54 = vadd.f32 %v2269_v2, %v1328_v52 }
 0x3e9   :  { %v1753_v55 = vpack.c.bf16 %v1329_v54, %v1327_v53 }
 0x3eb   :  { %1805 = vst [vmem:[%s2524_s7 + $0xd0] sm:$0xff] %v1753_v55  }
 0x3ee   :  { %v1331_v56 = vpop.f32.mrf.mxu3 }
 0x3ef   :  { %v1332_v58 = vadd.f32 %v2269_v2, %v1331_v56 }
 0x3f6   :  { %v1333_v57 = vpop.f32.mrf.mxu3 }
 0x3f7   :  { %v1334_v59 = vadd.f32 %v2269_v2, %v1333_v57 }
 0x3f9   :  { %v1758_v60 = vpack.c.bf16 %v1334_v59, %v1332_v58 }
 0x3fb   :  { %1806 = vst [vmem:[%s2524_s7 + $0xd8] sm:$0xff] %v1758_v60  }
 0x3fe   :  { %v1336_v61 = vpop.f32.mrf.mxu3 }
 0x3ff   :  { %v1337_v0 = vadd.f32 %v2269_v2, %v1336_v61 }
 0x406   :  { %v1338_v62 = vpop.f32.mrf.mxu3 }
 0x407   :  { %v1339_v1 = vadd.f32 %v2269_v2, %v1338_v62 }
 0x409   :  { %v1763_v4 = vpack.c.bf16 %v1339_v1, %v1337_v0 }
 0x40b   :  { %1807 = vst [vmem:[%s2524_s7 + $0xe0] sm:$0xff] %v1763_v4  }
 0x40e   :  { %v1341_v5 = vpop.f32.mrf.mxu3 }
 0x40f   :  { %v1342_v7 = vadd.f32 %v2269_v2, %v1341_v5 }
 0x416   :  { %v1343_v6 = vpop.f32.mrf.mxu3 }
 0x417   :  { %v1344_v8 = vadd.f32 %v2269_v2, %v1343_v6 }
 0x419   :  { %v1768_v3 = vpack.c.bf16 %v1344_v8, %v1342_v7 }
 0x41b   :  { %1808 = vst [vmem:[%s2524_s7 + $0xe8] sm:$0xff] %v1768_v3  }
 0x41e   :  { %v1346_v9 = vpop.f32.mrf.mxu3 }
 0x41f   :  { %v1347_v11 = vadd.f32 %v1816_v10, %v1346_v9 }
 0x426   :  { %v1348_v32 = vpop.f32.mrf.mxu3 }
 0x427   :  { %v1349_v12 = vadd.f32 %v1816_v10, %v1348_v32 }
 0x429   :  { %v1773_v13 = vpack.c.bf16 %v1349_v12, %v1347_v11 }
 0x42b   :  { %1809 = vst [vmem:[%s2524_s7 + $0xf0] sm:$0xff] %v1773_v13  }
 0x42e   :  { %v1351_v14 = vpop.f32.mrf.mxu3 }
 0x42f   :  { %v1352_v15 = vadd.f32 %v1816_v10, %v1351_v14 }
 0x436   :  { %v1353_v2 = vpop.f32.mrf.mxu3 }
 0x437   :  { %v1354_v16 = vadd.f32 %v1816_v10, %v1353_v2 }
 0x439   :  { %v1778_v17 = vpack.c.bf16 %v1354_v16, %v1352_v15 }
 0x43b   :  { %1810 = vst [vmem:[%s2524_s7 + $0xf8] sm:$0xff] %v1778_v17  }

</bundles_post_ra>
